<compile_context>
chip_gen: v7x
topology: tpu7x:2x2x1
jax: 0.10.0
libtpu: 0.0.40
codegen_flags: <defaults>
</compile_context>

<pallas_src>
import functools

import jax
import jax.numpy as jnp
from jax.experimental import pallas as pl
from jax.experimental.pallas import tpu as pltpu


def _decoder_kernel(x_ref, w_ref, g_ref, b_ref, o_ref, slab_ref, acc_ref, *,
                    C_in, T_max, phase_off, Lpad, Wp, Lout_pad,
                    qrow, qcol, n_spatial, eps):
    """One grid step: one sample x one block of output channels.

    x_ref:    [1, C_in, FLAT]            flattened padded input (compute dtype)
    w_ref:    [P, c_blk, T_max*C_in]     per-phase folded weight matrices (compute dtype)
    g_ref, b_ref: [c_blk, 1]             InstanceNorm affine params (f32)
    o_ref:    [1, P, c_blk, Lout_pad]    final normalized output (written once)
    slab_ref: [T_max*C_in, Lout_pad]     stacked contraction operand (scratch)
    acc_ref:  [P, c_blk, Lout_pad]       f32 conv accumulator (scratch)
    """
    c_blk = o_ref.shape[2]
    P = o_ref.shape[1]

    tot_sum = jnp.zeros((c_blk, 1), jnp.float32)
    tot_sq = jnp.zeros((c_blk, 1), jnp.float32)

    # In-kernel lane indices for the validity mask (junk lanes come from the padded row
    # stride Wp and the 128-rounded Lout_pad; they are cropped by the wrapper, the mask
    # only protects the statistics).  Row index via reciprocal-multiply (no vector idiv).
    lane = jax.lax.broadcasted_iota(jnp.int32, (1, Lout_pad), 1)
    row = ((lane.astype(jnp.float32) + 0.5) * (1.0 / Wp)).astype(jnp.int32)
    col = lane - row * Wp

    # ---- pass 1: one folded matmul per phase + masked stats, into the f32 accumulator ----
    for ph in range(P):
        offs = phase_off[ph]
        for t in range(T_max):
            if t < len(offs):
                eh, ew = offs[t]
                off = (eh + Lpad) * Wp + (ew + Lpad)              # static offset
                slab_ref[t * C_in:(t + 1) * C_in, :] = x_ref[0, :, off:off + Lout_pad]
            else:                                                 # phases with fewer taps
                slab_ref[t * C_in:(t + 1) * C_in, :] = jnp.zeros(
                    (C_in, Lout_pad), slab_ref.dtype)
        y = jnp.dot(w_ref[ph], slab_ref[...], preferred_element_type=jnp.float32)
        acc_ref[ph, :, :] = y

        valid = ((lane < qrow[ph] * Wp) & (col < qcol[ph])).astype(jnp.float32)
        ym = y * valid
        tot_sum = tot_sum + jnp.sum(ym, axis=-1, keepdims=True)
        tot_sq = tot_sq + jnp.sum(ym * ym, axis=-1, keepdims=True)

    # ---- InstanceNorm constants (biased variance; affine folded into one FMA) ----
    inv_n = 1.0 / float(n_spatial)
    mean = tot_sum * inv_n
    var = jnp.maximum(tot_sq * inv_n - mean * mean, 0.0)
    scale = g_ref[...] * jax.lax.rsqrt(var + eps)                 # [c_blk, 1]
    shift = b_ref[...] - mean * scale

    # ---- pass 2: fused normalize + affine + ReLU, single store per phase ----
    for ph in range(P):
        y = acc_ref[ph, :, :]
        o_ref[0, ph, :, :] = jnp.maximum(y * scale + shift, 0.0).astype(o_ref.dtype)


def _vmem_cap_bytes():
    try:
        cap = int(getattr(pltpu.get_tpu_info(), "vmem_capacity_bytes", 0))
        if cap > 0:
            return cap
    except Exception:
        pass
    return 64 << 20          # conservative (v7x-sized) default


def decoder_node_forward(x, weight, gamma, beta, *, stride, padding,
                         output_padding, eps=1e-5, compute_dtype=jnp.bfloat16):
    """x: [N, C_in, H, W]; weight: [C_in, C_out, K, K] (ConvTranspose2d layout, no bias)."""
    N, C_in, H, W = x.shape
    wc_in, C_out, K, _ = weight.shape
    assert wc_in == C_in
    s, p, op = int(stride), int(padding), int(output_padding)

    OH = (H - 1) * s - 2 * p + K + op
    OW = (W - 1) * s - 2 * p + K + op
    P = s * s
    Qh = -(-OH // s)            # phase rows computed per phase (ceil)
    Qw = -(-OW // s)            # phase cols (valid, before row-stride padding)

    # phase r -> [(k, shift e)] such that  out[q*s + r] += W[k] * x[q + e]
    taps = []
    for r in range(s):
        c = (r + p) % s
        taps.append(tuple((k, (r + p - k) // s) for k in range(c, K, s)))
    taps = tuple(taps)
    e_all = [e for tl in taps for (_, e) in tl] or [0]
    e_min, e_max = min(e_all), max(e_all)

    Lpad = max(0, -e_min)                                  # top/left zero pad of x
    Rh = max(0, (Qh - 1 + e_max) - (H - 1))                # bottom pad
    Rw = max(0, (Qw - 1 + e_max) - (W - 1))                # right pad
    Hp, Wp = H + Lpad + Rh, W + Lpad + Rw
    Lout = Qh * Wp                                         # flat length of one phase slab
    Lout_pad = ((Lout + 127) // 128) * 128                 # lane-dense output slab

    # per-phase static tap data: (kh,kw) for weights, (eh,ew) offsets, valid extents
    phase_kk, phase_off, qrow, qcol = [], [], [], []
    for rh in range(s):
        qv = (OH - rh + s - 1) // s if OH > rh else 0
        for rw in range(s):
            qwv = (OW - rw + s - 1) // s if OW > rw else 0
            phase_kk.append(tuple((kh, kw) for (kh, _) in taps[rh] for (kw, _) in taps[rw]))
            phase_off.append(tuple((eh, ew) for (_, eh) in taps[rh] for (_, ew) in taps[rw]))
            qrow.append(qv)
            qcol.append(qwv)
    T_max = max(1, max(len(o) for o in phase_off))

    # pad + flatten the input once -- this (not an im2col tensor) is what hits HBM
    xp = jnp.pad(x, ((0, 0), (0, 0), (Lpad, Rh), (Lpad, Rw)))
    max_off = (e_max + Lpad) * Wp + (e_max + Lpad)
    FLAT = max(Hp * Wp, max_off + Lout_pad)
    FLAT = ((FLAT + 127) // 128) * 128                     # lane-dense input slab
    x_flat = jnp.zeros((N, C_in, FLAT), compute_dtype)
    x_flat = x_flat.at[:, :, :Hp * Wp].set(
        xp.reshape(N, C_in, Hp * Wp).astype(compute_dtype))

    cbytes = jnp.dtype(compute_dtype).itemsize
    obytes = jnp.dtype(x.dtype).itemsize

    # output-channel blocking: pad C_out to a multiple of 128 when large so the MXU M dim
    # stays native and the (N, j) grid keeps a parallel axis for megacore / dual-TC sharding
    if C_out <= 128:
        C_out_pad, c_blk = C_out, C_out
    else:
        C_out_pad = ((C_out + 127) // 128) * 128
        c_blk = 128
        blk256 = 2 * P * 256 * Lout_pad * obytes + P * 256 * Lout_pad * 4
        if C_out_pad % 256 == 0 and blk256 < (24 << 20):
            c_blk = 256                                    # v6e/v7x-native M tile
    n_cblk = C_out_pad // c_blk

    # per-phase folded weights: wf[ph, co, t*C_in + ci] = weight[ci, co, kh_t, kw_t]
    # (direct conv-transpose formula, no kernel flip); padded channels / tap slots are zero
    wf = jnp.zeros((P, C_out_pad, T_max, C_in), jnp.float32)
    for ph, kk in enumerate(phase_kk):
        for t, (kh, kw) in enumerate(kk):
            wf = wf.at[ph, :C_out, t, :].set(weight[:, :, kh, kw].astype(jnp.float32).T)
    wf = wf.reshape(P, C_out_pad, T_max * C_in).astype(compute_dtype)

    g2 = jnp.ones((C_out_pad, 1), jnp.float32).at[:C_out, 0].set(gamma.astype(jnp.float32))
    b2 = jnp.zeros((C_out_pad, 1), jnp.float32).at[:C_out, 0].set(beta.astype(jnp.float32))

    # VMEM budget from the real block/scratch sizes, capped below physical VMEM
    est = (2 * (C_in * FLAT * cbytes                       # x block (double-buffered)
                + P * c_blk * T_max * C_in * cbytes        # folded weights
                + 2 * c_blk * 4                            # gamma / beta
                + P * c_blk * Lout_pad * obytes)           # output block
           + T_max * C_in * Lout_pad * cbytes              # slab scratch
           + P * c_blk * Lout_pad * 4)                     # f32 accumulator scratch
    cap = _vmem_cap_bytes() - (8 << 20)
    vmem_limit = int(min(cap, max(32 << 20, 2 * est + (4 << 20))))
    vmem_limit = max(vmem_limit, est + (2 << 20))

    kernel = functools.partial(
        _decoder_kernel, C_in=C_in, T_max=T_max, phase_off=tuple(phase_off),
        Lpad=Lpad, Wp=Wp, Lout_pad=Lout_pad, qrow=tuple(qrow), qcol=tuple(qcol),
        n_spatial=OH * OW, eps=float(eps))

    out4 = pl.pallas_call(
        kernel,
        out_shape=jax.ShapeDtypeStruct((N, P, C_out_pad, Lout_pad), x.dtype),
        grid=(N, n_cblk),
        in_specs=[
            pl.BlockSpec((1, C_in, FLAT), lambda n, j: (n, 0, 0)),
            pl.BlockSpec((P, c_blk, T_max * C_in), lambda n, j: (0, j, 0)),
            pl.BlockSpec((c_blk, 1), lambda n, j: (j, 0)),
            pl.BlockSpec((c_blk, 1), lambda n, j: (j, 0)),
        ],
        out_specs=pl.BlockSpec((1, P, c_blk, Lout_pad), lambda n, j: (n, 0, j, 0)),
        scratch_shapes=[
            pltpu.VMEM((T_max * C_in, Lout_pad), compute_dtype),
            pltpu.VMEM((P, c_blk, Lout_pad), jnp.float32),
        ],
        compiler_params=pltpu.CompilerParams(
            dimension_semantics=("parallel", "parallel"),
            vmem_limit_bytes=vmem_limit),
    )(x_flat, wf, g2, b2)

    # interleave the s*s phases back to NCHW and crop channel padding / junk rows & cols
    out6 = out4[:, :, :C_out, :Lout].reshape(N, s, s, C_out, Qh, Wp)
    out = out6.transpose(0, 3, 4, 1, 5, 2).reshape(N, C_out, Qh * s, Wp * s)
    return out[:, :, :OH, :OW]


def _reference(x, weight, gamma, beta, *, stride, padding, output_padding,
               eps=1e-5, compute_dtype=jnp.float32):
    """Pure-JAX reference (conv_general_dilated with lhs dilation == conv transpose)."""
    C_in, C_out, K, _ = weight.shape
    w_oihw = jnp.flip(weight, axis=(2, 3)).transpose(1, 0, 2, 3)   # [C_out, C_in, K, K]
    pad = (K - 1 - padding, K - 1 - padding + output_padding)
    y = jax.lax.conv_general_dilated(
        x.astype(compute_dtype), w_oihw.astype(compute_dtype),
        window_strides=(1, 1), padding=[pad, pad],
        lhs_dilation=(stride, stride),
        dimension_numbers=("NCHW", "OIHW", "NCHW"),
        preferred_element_type=jnp.float32)
    mean = jnp.mean(y, axis=(2, 3), keepdims=True)
    var = jnp.mean(jnp.square(y - mean), axis=(2, 3), keepdims=True)
    y = (y - mean) * jax.lax.rsqrt(var + eps)
    y = y * gamma.reshape(1, -1, 1, 1) + beta.reshape(1, -1, 1, 1)
    return jnp.maximum(y, 0.0)


if __name__ == "__main__":
    # DecorderNode(in_dim=4, out_dim=8, kernel_size=4, stride=2, padding=1, output_padding=0)
    N, C_in, H, W = 2, 4, 16, 16
    C_out, K, stride, padding, output_padding = 8, 4, 2, 1, 0

    key = jax.random.PRNGKey(0)
    kx, kw = jax.random.split(key)
    x = jax.random.normal(kx, (N, C_in, H, W), dtype=jnp.float32)
    # deterministic stand-in for `kernel_initializer` (normal(0, 0.02), typical GAN init)
    weight = 0.02 * jax.random.normal(kw, (C_in, C_out, K, K), dtype=jnp.float32)
    # InstanceNorm2d(affine=True) default init: weight=1, bias=0
    gamma = jnp.ones((C_out,), dtype=jnp.float32)
    beta = jnp.zeros((C_out,), dtype=jnp.float32)

    OH = (H - 1) * stride - 2 * padding + K + output_padding
    OW = (W - 1) * stride - 2 * padding + K + output_padding

    # f32 compute path: tight check against the pure-JAX reference
    out_f32 = jax.block_until_ready(decoder_node_forward(
        x, weight, gamma, beta, stride=stride, padding=padding,
        output_padding=output_padding, compute_dtype=jnp.float32))
    ref_f32 = _reference(x, weight, gamma, beta, stride=stride, padding=padding,
                         output_padding=output_padding, compute_dtype=jnp.float32)
    assert out_f32.shape == (N, C_out, OH, OW)
    assert jnp.allclose(out_f32, ref_f32, atol=1e-4, rtol=1e-4), "f32 mismatch vs reference"

    # bf16-streamed path (the performance configuration for v6e/v7x MXUs)
    out_bf16 = jax.block_until_ready(decoder_node_forward(
        x, weight, gamma, beta, stride=stride, padding=padding,
        output_padding=output_padding, compute_dtype=jnp.bfloat16))
    ref_bf16 = _reference(x, weight, gamma, beta, stride=stride, padding=padding,
                          output_padding=output_padding, compute_dtype=jnp.bfloat16)
    assert out_bf16.shape == (N, C_out, OH, OW)
    assert jnp.allclose(out_bf16, ref_bf16, atol=2e-2, rtol=2e-2), "bf16 mismatch vs reference"

    print("KERNEL_OK")
</pallas_src>

<mosaic_0001>
module attributes {stable_mosaic.version = 11 : i64} {
  func.func @_decoder_kernel(%arg0: i32, %arg1: i32, %arg2: memref<1x4x512xf32, #tpu.memory_space<vmem>>, %arg3: memref<4x8x16xf32, #tpu.memory_space<vmem>>, %arg4: memref<8x1xf32, #tpu.memory_space<vmem>>, %arg5: memref<8x1xf32, #tpu.memory_space<vmem>>, %arg6: memref<1x4x8x384xf32, #tpu.memory_space<vmem>>, %arg7: memref<16x384xf32, #tpu.memory_space<vmem>>, %arg8: memref<4x8x384xf32, #tpu.memory_space<vmem>>) attributes {dimension_semantics = [#tpu.dimension_semantics<parallel>, #tpu.dimension_semantics<parallel>], iteration_bounds = array<i64: 2, 1>, scalar_prefetch = 0 : i64, scratch_operands = 2 : i64, tpu.core_type = #tpu.core_type<tc>, window_params = [{transform_indices = @transform_0, window_bounds = array<i64: 1, 4, 512>}, {transform_indices = @transform_1, window_bounds = array<i64: 4, 8, 16>}, {transform_indices = @transform_2, window_bounds = array<i64: 8, 1>}, {transform_indices = @transform_3, window_bounds = array<i64: 8, 1>}, {transform_indices = @transform_4, window_bounds = array<i64: 1, 4, 8, 384>}]} {
    %cst = arith.constant 0.000000e+00 : f32
    %0 = vector.broadcast %cst : f32 to vector<8x1xf32>
    %cst_0 = arith.constant 0.000000e+00 : f32
    %1 = vector.broadcast %cst_0 : f32 to vector<8x1xf32>
    %2 = tpu.iota {dimensions = array<i32: 1>} : vector<1x384xi32>
    %3 = arith.sitofp %2 : vector<1x384xi32> to vector<1x384xf32>
    %cst_1 = arith.constant 5.000000e-01 : f32
    %4 = vector.broadcast %cst_1 : f32 to vector<1x384xf32>
    %5 = arith.addf %3, %4 : vector<1x384xf32>
    %cst_2 = arith.constant 0.055555556 : f32
    %6 = vector.broadcast %cst_2 : f32 to vector<1x384xf32>
    %7 = arith.mulf %5, %6 : vector<1x384xf32>
    %8 = arith.fptosi %7 : vector<1x384xf32> to vector<1x384xi32>
    %c18_i32 = arith.constant 18 : i32
    %9 = vector.broadcast %c18_i32 : i32 to vector<1x384xi32>
    %10 = arith.muli %8, %9 : vector<1x384xi32>
    %11 = arith.subi %2, %10 : vector<1x384xi32>
    %c0 = arith.constant 0 : index
    %c0_3 = arith.constant 0 : index
    %c19 = arith.constant 19 : index
    %12 = vector.load %arg2[%c0, %c0_3, %c19] : memref<1x4x512xf32, #tpu.memory_space<vmem>>, vector<1x4x384xf32>
    %13 = vector.shape_cast %12 : vector<1x4x384xf32> to vector<4x384xf32>
    %c0_4 = arith.constant 0 : index
    %c0_5 = arith.constant 0 : index
    %14 = vector.load %arg7[%c0_4, %c0_5] : memref<16x384xf32, #tpu.memory_space<vmem>>, vector<4x384xf32>
    tpu.vector_store %arg7[%c0_4, %c0_5], %13 {strides = array<i32>} : memref<16x384xf32, #tpu.memory_space<vmem>>, vector<4x384xf32>,
    %c0_6 = arith.constant 0 : index
    %c0_7 = arith.constant 0 : index
    %c18 = arith.constant 18 : index
    %15 = vector.load %arg2[%c0_6, %c0_7, %c18] : memref<1x4x512xf32, #tpu.memory_space<vmem>>, vector<1x4x384xf32>
    %16 = vector.shape_cast %15 : vector<1x4x384xf32> to vector<4x384xf32>
    %c4 = arith.constant 4 : index
    %c0_8 = arith.constant 0 : index
    %17 = vector.load %arg7[%c4, %c0_8] : memref<16x384xf32, #tpu.memory_space<vmem>>, vector<4x384xf32>
    tpu.vector_store %arg7[%c4, %c0_8], %16 {strides = array<i32>} : memref<16x384xf32, #tpu.memory_space<vmem>>, vector<4x384xf32>,
    %c0_9 = arith.constant 0 : index
    %c0_10 = arith.constant 0 : index
    %c1 = arith.constant 1 : index
    %18 = vector.load %arg2[%c0_9, %c0_10, %c1] : memref<1x4x512xf32, #tpu.memory_space<vmem>>, vector<1x4x384xf32>
    %19 = vector.shape_cast %18 : vector<1x4x384xf32> to vector<4x384xf32>
    %c8 = arith.constant 8 : index
    %c0_11 = arith.constant 0 : index
    %20 = vector.load %arg7[%c8, %c0_11] : memref<16x384xf32, #tpu.memory_space<vmem>>, vector<4x384xf32>
    tpu.vector_store %arg7[%c8, %c0_11], %19 {strides = array<i32>} : memref<16x384xf32, #tpu.memory_space<vmem>>, vector<4x384xf32>,
    %c0_12 = arith.constant 0 : index
    %c0_13 = arith.constant 0 : index
    %c0_14 = arith.constant 0 : index
    %21 = vector.load %arg2[%c0_12, %c0_13, %c0_14] : memref<1x4x512xf32, #tpu.memory_space<vmem>>, vector<1x4x384xf32>
    %22 = vector.shape_cast %21 : vector<1x4x384xf32> to vector<4x384xf32>
    %c12 = arith.constant 12 : index
    %c0_15 = arith.constant 0 : index
    %23 = vector.load %arg7[%c12, %c0_15] : memref<16x384xf32, #tpu.memory_space<vmem>>, vector<4x384xf32>
    tpu.vector_store %arg7[%c12, %c0_15], %22 {strides = array<i32>} : memref<16x384xf32, #tpu.memory_space<vmem>>, vector<4x384xf32>,
    %c0_16 = arith.constant 0 : index
    %c0_17 = arith.constant 0 : index
    %c0_18 = arith.constant 0 : index
    %24 = vector.load %arg3[%c0_16, %c0_17, %c0_18] : memref<4x8x16xf32, #tpu.memory_space<vmem>>, vector<1x8x16xf32>
    %25 = vector.shape_cast %24 : vector<1x8x16xf32> to vector<8x16xf32>
    %c0_19 = arith.constant 0 : index
    %c0_20 = arith.constant 0 : index
    %26 = vector.load %arg7[%c0_19, %c0_20] : memref<16x384xf32, #tpu.memory_space<vmem>>, vector<16x384xf32>
    %cst_21 = arith.constant dense<0.000000e+00> : vector<8x384xf32>
    %27 = tpu.matmul %25, %26, %cst_21 {dimension_numbers = #tpu.dot_dimension_numbers<[1], [0], [0], [1], [0, 0, 1, 1], [], []>} : vector<8x16xf32>, vector<16x384xf32>, vector<8x384xf32> -> vector<8x384xf32>
    %c0_22 = arith.constant 0 : index
    %c0_23 = arith.constant 0 : index
    %c0_24 = arith.constant 0 : index
    %28 = vector.load %arg8[%c0_22, %c0_23, %c0_24] : memref<4x8x384xf32, #tpu.memory_space<vmem>>, vector<1x8x384xf32>
    %29 = vector.shape_cast %28 : vector<1x8x384xf32> to vector<8x384xf32>
    %30 = vector.shape_cast %27 : vector<8x384xf32> to vector<1x8x384xf32>
    tpu.vector_store %arg8[%c0_22, %c0_23, %c0_24], %30 {strides = array<i32>} : memref<4x8x384xf32, #tpu.memory_space<vmem>>, vector<1x8x384xf32>,
    %c288_i32 = arith.constant 288 : i32
    %31 = vector.broadcast %c288_i32 : i32 to vector<1x384xi32>
    %32 = arith.cmpi slt, %2, %31 : vector<1x384xi32>
    %c16_i32 = arith.constant 16 : i32
    %33 = vector.broadcast %c16_i32 : i32 to vector<1x384xi32>
    %34 = arith.cmpi slt, %11, %33 : vector<1x384xi32>
    %35 = arith.andi %32, %34 : vector<1x384xi1>
    %36 = arith.extui %35 : vector<1x384xi1> to vector<1x384xi32>
    %37 = arith.sitofp %36 : vector<1x384xi32> to vector<1x384xf32>
    %38 = vector.broadcast %37 : vector<1x384xf32> to vector<8x384xf32>
    %39 = arith.mulf %27, %38 : vector<8x384xf32>
    %cst_25 = arith.constant dense<0.000000e+00> : vector<8xf32>
    %40 = vector.multi_reduction <add>, %39, %cst_25 [1] : vector<8x384xf32> to vector<8xf32>
    %41 = vector.shape_cast %40 : vector<8xf32> to vector<8x1xf32>
    %42 = arith.addf %0, %41 : vector<8x1xf32>
    %43 = arith.mulf %39, %39 : vector<8x384xf32>
    %cst_26 = arith.constant dense<0.000000e+00> : vector<8xf32>
    %44 = vector.multi_reduction <add>, %43, %cst_26 [1] : vector<8x384xf32> to vector<8xf32>
    %45 = vector.shape_cast %44 : vector<8xf32> to vector<8x1xf32>
    %46 = arith.addf %1, %45 : vector<8x1xf32>
    %c0_27 = arith.constant 0 : index
    %c0_28 = arith.constant 0 : index
    %c20 = arith.constant 20 : index
    %47 = vector.load %arg2[%c0_27, %c0_28, %c20] : memref<1x4x512xf32, #tpu.memory_space<vmem>>, vector<1x4x384xf32>
    %48 = vector.shape_cast %47 : vector<1x4x384xf32> to vector<4x384xf32>
    %c0_29 = arith.constant 0 : index
    %c0_30 = arith.constant 0 : index
    %49 = vector.load %arg7[%c0_29, %c0_30] : memref<16x384xf32, #tpu.memory_space<vmem>>, vector<4x384xf32>
    tpu.vector_store %arg7[%c0_29, %c0_30], %48 {strides = array<i32>} : memref<16x384xf32, #tpu.memory_space<vmem>>, vector<4x384xf32>,
    %c0_31 = arith.constant 0 : index
    %c0_32 = arith.constant 0 : index
    %c19_33 = arith.constant 19 : index
    %50 = vector.load %arg2[%c0_31, %c0_32, %c19_33] : memref<1x4x512xf32, #tpu.memory_space<vmem>>, vector<1x4x384xf32>
    %51 = vector.shape_cast %50 : vector<1x4x384xf32> to vector<4x384xf32>
    %c4_34 = arith.constant 4 : index
    %c0_35 = arith.constant 0 : index
    %52 = vector.load %arg7[%c4_34, %c0_35] : memref<16x384xf32, #tpu.memory_space<vmem>>, vector<4x384xf32>
    tpu.vector_store %arg7[%c4_34, %c0_35], %51 {strides = array<i32>} : memref<16x384xf32, #tpu.memory_space<vmem>>, vector<4x384xf32>,
    %c0_36 = arith.constant 0 : index
    %c0_37 = arith.constant 0 : index
    %c2 = arith.constant 2 : index
    %53 = vector.load %arg2[%c0_36, %c0_37, %c2] : memref<1x4x512xf32, #tpu.memory_space<vmem>>, vector<1x4x384xf32>
    %54 = vector.shape_cast %53 : vector<1x4x384xf32> to vector<4x384xf32>
    %c8_38 = arith.constant 8 : index
    %c0_39 = arith.constant 0 : index
    %55 = vector.load %arg7[%c8_38, %c0_39] : memref<16x384xf32, #tpu.memory_space<vmem>>, vector<4x384xf32>
    tpu.vector_store %arg7[%c8_38, %c0_39], %54 {strides = array<i32>} : memref<16x384xf32, #tpu.memory_space<vmem>>, vector<4x384xf32>,
    %c0_40 = arith.constant 0 : index
    %c0_41 = arith.constant 0 : index
    %c1_42 = arith.constant 1 : index
    %56 = vector.load %arg2[%c0_40, %c0_41, %c1_42] : memref<1x4x512xf32, #tpu.memory_space<vmem>>, vector<1x4x384xf32>
    %57 = vector.shape_cast %56 : vector<1x4x384xf32> to vector<4x384xf32>
    %c12_43 = arith.constant 12 : index
    %c0_44 = arith.constant 0 : index
    %58 = vector.load %arg7[%c12_43, %c0_44] : memref<16x384xf32, #tpu.memory_space<vmem>>, vector<4x384xf32>
    tpu.vector_store %arg7[%c12_43, %c0_44], %57 {strides = array<i32>} : memref<16x384xf32, #tpu.memory_space<vmem>>, vector<4x384xf32>,
    %c1_45 = arith.constant 1 : index
    %c0_46 = arith.constant 0 : index
    %c0_47 = arith.constant 0 : index
    %59 = vector.load %arg3[%c1_45, %c0_46, %c0_47] : memref<4x8x16xf32, #tpu.memory_space<vmem>>, vector<1x8x16xf32>
    %60 = vector.shape_cast %59 : vector<1x8x16xf32> to vector<8x16xf32>
    %c0_48 = arith.constant 0 : index
    %c0_49 = arith.constant 0 : index
    %61 = vector.load %arg7[%c0_48, %c0_49] : memref<16x384xf32, #tpu.memory_space<vmem>>, vector<16x384xf32>
    %cst_50 = arith.constant dense<0.000000e+00> : vector<8x384xf32>
    %62 = tpu.matmul %60, %61, %cst_50 {dimension_numbers = #tpu.dot_dimension_numbers<[1], [0], [0], [1], [0, 0, 1, 1], [], []>} : vector<8x16xf32>, vector<16x384xf32>, vector<8x384xf32> -> vector<8x384xf32>
    %c1_51 = arith.constant 1 : index
    %c0_52 = arith.constant 0 : index
    %c0_53 = arith.constant 0 : index
    %63 = vector.load %arg8[%c1_51, %c0_52, %c0_53] : memref<4x8x384xf32, #tpu.memory_space<vmem>>, vector<1x8x384xf32>
    %64 = vector.shape_cast %63 : vector<1x8x384xf32> to vector<8x384xf32>
    %65 = vector.shape_cast %62 : vector<8x384xf32> to vector<1x8x384xf32>
    tpu.vector_store %arg8[%c1_51, %c0_52, %c0_53], %65 {strides = array<i32>} : memref<4x8x384xf32, #tpu.memory_space<vmem>>, vector<1x8x384xf32>,
    %c288_i32_54 = arith.constant 288 : i32
    %66 = vector.broadcast %c288_i32_54 : i32 to vector<1x384xi32>
    %67 = arith.cmpi slt, %2, %66 : vector<1x384xi32>
    %c16_i32_55 = arith.constant 16 : i32
    %68 = vector.broadcast %c16_i32_55 : i32 to vector<1x384xi32>
    %69 = arith.cmpi slt, %11, %68 : vector<1x384xi32>
    %70 = arith.andi %67, %69 : vector<1x384xi1>
    %71 = arith.extui %70 : vector<1x384xi1> to vector<1x384xi32>
    %72 = arith.sitofp %71 : vector<1x384xi32> to vector<1x384xf32>
    %73 = vector.broadcast %72 : vector<1x384xf32> to vector<8x384xf32>
    %74 = arith.mulf %62, %73 : vector<8x384xf32>
    %cst_56 = arith.constant dense<0.000000e+00> : vector<8xf32>
    %75 = vector.multi_reduction <add>, %74, %cst_56 [1] : vector<8x384xf32> to vector<8xf32>
    %76 = vector.shape_cast %75 : vector<8xf32> to vector<8x1xf32>
    %77 = arith.addf %42, %76 : vector<8x1xf32>
    %78 = arith.mulf %74, %74 : vector<8x384xf32>
    %cst_57 = arith.constant dense<0.000000e+00> : vector<8xf32>
    %79 = vector.multi_reduction <add>, %78, %cst_57 [1] : vector<8x384xf32> to vector<8xf32>
    %80 = vector.shape_cast %79 : vector<8xf32> to vector<8x1xf32>
    %81 = arith.addf %46, %80 : vector<8x1xf32>
    %c0_58 = arith.constant 0 : index
    %c0_59 = arith.constant 0 : index
    %c37 = arith.constant 37 : index
    %82 = vector.load %arg2[%c0_58, %c0_59, %c37] : memref<1x4x512xf32, #tpu.memory_space<vmem>>, vector<1x4x384xf32>
    %83 = vector.shape_cast %82 : vector<1x4x384xf32> to vector<4x384xf32>
    %c0_60 = arith.constant 0 : index
    %c0_61 = arith.constant 0 : index
    %84 = vector.load %arg7[%c0_60, %c0_61] : memref<16x384xf32, #tpu.memory_space<vmem>>, vector<4x384xf32>
    tpu.vector_store %arg7[%c0_60, %c0_61], %83 {strides = array<i32>} : memref<16x384xf32, #tpu.memory_space<vmem>>, vector<4x384xf32>,
    %c0_62 = arith.constant 0 : index
    %c0_63 = arith.constant 0 : index
    %c36 = arith.constant 36 : index
    %85 = vector.load %arg2[%c0_62, %c0_63, %c36] : memref<1x4x512xf32, #tpu.memory_space<vmem>>, vector<1x4x384xf32>
    %86 = vector.shape_cast %85 : vector<1x4x384xf32> to vector<4x384xf32>
    %c4_64 = arith.constant 4 : index
    %c0_65 = arith.constant 0 : index
    %87 = vector.load %arg7[%c4_64, %c0_65] : memref<16x384xf32, #tpu.memory_space<vmem>>, vector<4x384xf32>
    tpu.vector_store %arg7[%c4_64, %c0_65], %86 {strides = array<i32>} : memref<16x384xf32, #tpu.memory_space<vmem>>, vector<4x384xf32>,
    %c0_66 = arith.constant 0 : index
    %c0_67 = arith.constant 0 : index
    %c19_68 = arith.constant 19 : index
    %88 = vector.load %arg2[%c0_66, %c0_67, %c19_68] : memref<1x4x512xf32, #tpu.memory_space<vmem>>, vector<1x4x384xf32>
    %89 = vector.shape_cast %88 : vector<1x4x384xf32> to vector<4x384xf32>
    %c8_69 = arith.constant 8 : index
    %c0_70 = arith.constant 0 : index
    %90 = vector.load %arg7[%c8_69, %c0_70] : memref<16x384xf32, #tpu.memory_space<vmem>>, vector<4x384xf32>
    tpu.vector_store %arg7[%c8_69, %c0_70], %89 {strides = array<i32>} : memref<16x384xf32, #tpu.memory_space<vmem>>, vector<4x384xf32>,
    %c0_71 = arith.constant 0 : index
    %c0_72 = arith.constant 0 : index
    %c18_73 = arith.constant 18 : index
    %91 = vector.load %arg2[%c0_71, %c0_72, %c18_73] : memref<1x4x512xf32, #tpu.memory_space<vmem>>, vector<1x4x384xf32>
    %92 = vector.shape_cast %91 : vector<1x4x384xf32> to vector<4x384xf32>
    %c12_74 = arith.constant 12 : index
    %c0_75 = arith.constant 0 : index
    %93 = vector.load %arg7[%c12_74, %c0_75] : memref<16x384xf32, #tpu.memory_space<vmem>>, vector<4x384xf32>
    tpu.vector_store %arg7[%c12_74, %c0_75], %92 {strides = array<i32>} : memref<16x384xf32, #tpu.memory_space<vmem>>, vector<4x384xf32>,
    %c2_76 = arith.constant 2 : index
    %c0_77 = arith.constant 0 : index
    %c0_78 = arith.constant 0 : index
    %94 = vector.load %arg3[%c2_76, %c0_77, %c0_78] : memref<4x8x16xf32, #tpu.memory_space<vmem>>, vector<1x8x16xf32>
    %95 = vector.shape_cast %94 : vector<1x8x16xf32> to vector<8x16xf32>
    %c0_79 = arith.constant 0 : index
    %c0_80 = arith.constant 0 : index
    %96 = vector.load %arg7[%c0_79, %c0_80] : memref<16x384xf32, #tpu.memory_space<vmem>>, vector<16x384xf32>
    %cst_81 = arith.constant dense<0.000000e+00> : vector<8x384xf32>
    %97 = tpu.matmul %95, %96, %cst_81 {dimension_numbers = #tpu.dot_dimension_numbers<[1], [0], [0], [1], [0, 0, 1, 1], [], []>} : vector<8x16xf32>, vector<16x384xf32>, vector<8x384xf32> -> vector<8x384xf32>
    %c2_82 = arith.constant 2 : index
    %c0_83 = arith.constant 0 : index
    %c0_84 = arith.constant 0 : index
    %98 = vector.load %arg8[%c2_82, %c0_83, %c0_84] : memref<4x8x384xf32, #tpu.memory_space<vmem>>, vector<1x8x384xf32>
    %99 = vector.shape_cast %98 : vector<1x8x384xf32> to vector<8x384xf32>
    %100 = vector.shape_cast %97 : vector<8x384xf32> to vector<1x8x384xf32>
    tpu.vector_store %arg8[%c2_82, %c0_83, %c0_84], %100 {strides = array<i32>} : memref<4x8x384xf32, #tpu.memory_space<vmem>>, vector<1x8x384xf32>,
    %c288_i32_85 = arith.constant 288 : i32
    %101 = vector.broadcast %c288_i32_85 : i32 to vector<1x384xi32>
    %102 = arith.cmpi slt, %2, %101 : vector<1x384xi32>
    %c16_i32_86 = arith.constant 16 : i32
    %103 = vector.broadcast %c16_i32_86 : i32 to vector<1x384xi32>
    %104 = arith.cmpi slt, %11, %103 : vector<1x384xi32>
    %105 = arith.andi %102, %104 : vector<1x384xi1>
    %106 = arith.extui %105 : vector<1x384xi1> to vector<1x384xi32>
    %107 = arith.sitofp %106 : vector<1x384xi32> to vector<1x384xf32>
    %108 = vector.broadcast %107 : vector<1x384xf32> to vector<8x384xf32>
    %109 = arith.mulf %97, %108 : vector<8x384xf32>
    %cst_87 = arith.constant dense<0.000000e+00> : vector<8xf32>
    %110 = vector.multi_reduction <add>, %109, %cst_87 [1] : vector<8x384xf32> to vector<8xf32>
    %111 = vector.shape_cast %110 : vector<8xf32> to vector<8x1xf32>
    %112 = arith.addf %77, %111 : vector<8x1xf32>
    %113 = arith.mulf %109, %109 : vector<8x384xf32>
    %cst_88 = arith.constant dense<0.000000e+00> : vector<8xf32>
    %114 = vector.multi_reduction <add>, %113, %cst_88 [1] : vector<8x384xf32> to vector<8xf32>
    %115 = vector.shape_cast %114 : vector<8xf32> to vector<8x1xf32>
    %116 = arith.addf %81, %115 : vector<8x1xf32>
    %c0_89 = arith.constant 0 : index
    %c0_90 = arith.constant 0 : index
    %c38 = arith.constant 38 : index
    %117 = vector.load %arg2[%c0_89, %c0_90, %c38] : memref<1x4x512xf32, #tpu.memory_space<vmem>>, vector<1x4x384xf32>
    %118 = vector.shape_cast %117 : vector<1x4x384xf32> to vector<4x384xf32>
    %c0_91 = arith.constant 0 : index
    %c0_92 = arith.constant 0 : index
    %119 = vector.load %arg7[%c0_91, %c0_92] : memref<16x384xf32, #tpu.memory_space<vmem>>, vector<4x384xf32>
    tpu.vector_store %arg7[%c0_91, %c0_92], %118 {strides = array<i32>} : memref<16x384xf32, #tpu.memory_space<vmem>>, vector<4x384xf32>,
    %c0_93 = arith.constant 0 : index
    %c0_94 = arith.constant 0 : index
    %c37_95 = arith.constant 37 : index
    %120 = vector.load %arg2[%c0_93, %c0_94, %c37_95] : memref<1x4x512xf32, #tpu.memory_space<vmem>>, vector<1x4x384xf32>
    %121 = vector.shape_cast %120 : vector<1x4x384xf32> to vector<4x384xf32>
    %c4_96 = arith.constant 4 : index
    %c0_97 = arith.constant 0 : index
    %122 = vector.load %arg7[%c4_96, %c0_97] : memref<16x384xf32, #tpu.memory_space<vmem>>, vector<4x384xf32>
    tpu.vector_store %arg7[%c4_96, %c0_97], %121 {strides = array<i32>} : memref<16x384xf32, #tpu.memory_space<vmem>>, vector<4x384xf32>,
    %c0_98 = arith.constant 0 : index
    %c0_99 = arith.constant 0 : index
    %c20_100 = arith.constant 20 : index
    %123 = vector.load %arg2[%c0_98, %c0_99, %c20_100] : memref<1x4x512xf32, #tpu.memory_space<vmem>>, vector<1x4x384xf32>
    %124 = vector.shape_cast %123 : vector<1x4x384xf32> to vector<4x384xf32>
    %c8_101 = arith.constant 8 : index
    %c0_102 = arith.constant 0 : index
    %125 = vector.load %arg7[%c8_101, %c0_102] : memref<16x384xf32, #tpu.memory_space<vmem>>, vector<4x384xf32>
    tpu.vector_store %arg7[%c8_101, %c0_102], %124 {strides = array<i32>} : memref<16x384xf32, #tpu.memory_space<vmem>>, vector<4x384xf32>,
    %c0_103 = arith.constant 0 : index
    %c0_104 = arith.constant 0 : index
    %c19_105 = arith.constant 19 : index
    %126 = vector.load %arg2[%c0_103, %c0_104, %c19_105] : memref<1x4x512xf32, #tpu.memory_space<vmem>>, vector<1x4x384xf32>
    %127 = vector.shape_cast %126 : vector<1x4x384xf32> to vector<4x384xf32>
    %c12_106 = arith.constant 12 : index
    %c0_107 = arith.constant 0 : index
    %128 = vector.load %arg7[%c12_106, %c0_107] : memref<16x384xf32, #tpu.memory_space<vmem>>, vector<4x384xf32>
    tpu.vector_store %arg7[%c12_106, %c0_107], %127 {strides = array<i32>} : memref<16x384xf32, #tpu.memory_space<vmem>>, vector<4x384xf32>,
    %c3 = arith.constant 3 : index
    %c0_108 = arith.constant 0 : index
    %c0_109 = arith.constant 0 : index
    %129 = vector.load %arg3[%c3, %c0_108, %c0_109] : memref<4x8x16xf32, #tpu.memory_space<vmem>>, vector<1x8x16xf32>
    %130 = vector.shape_cast %129 : vector<1x8x16xf32> to vector<8x16xf32>
    %c0_110 = arith.constant 0 : index
    %c0_111 = arith.constant 0 : index
    %131 = vector.load %arg7[%c0_110, %c0_111] : memref<16x384xf32, #tpu.memory_space<vmem>>, vector<16x384xf32>
    %cst_112 = arith.constant dense<0.000000e+00> : vector<8x384xf32>
    %132 = tpu.matmul %130, %131, %cst_112 {dimension_numbers = #tpu.dot_dimension_numbers<[1], [0], [0], [1], [0, 0, 1, 1], [], []>} : vector<8x16xf32>, vector<16x384xf32>, vector<8x384xf32> -> vector<8x384xf32>
    %c3_113 = arith.constant 3 : index
    %c0_114 = arith.constant 0 : index
    %c0_115 = arith.constant 0 : index
    %133 = vector.load %arg8[%c3_113, %c0_114, %c0_115] : memref<4x8x384xf32, #tpu.memory_space<vmem>>, vector<1x8x384xf32>
    %134 = vector.shape_cast %133 : vector<1x8x384xf32> to vector<8x384xf32>
    %135 = vector.shape_cast %132 : vector<8x384xf32> to vector<1x8x384xf32>
    tpu.vector_store %arg8[%c3_113, %c0_114, %c0_115], %135 {strides = array<i32>} : memref<4x8x384xf32, #tpu.memory_space<vmem>>, vector<1x8x384xf32>,
    %c288_i32_116 = arith.constant 288 : i32
    %136 = vector.broadcast %c288_i32_116 : i32 to vector<1x384xi32>
    %137 = arith.cmpi slt, %2, %136 : vector<1x384xi32>
    %c16_i32_117 = arith.constant 16 : i32
    %138 = vector.broadcast %c16_i32_117 : i32 to vector<1x384xi32>
    %139 = arith.cmpi slt, %11, %138 : vector<1x384xi32>
    %140 = arith.andi %137, %139 : vector<1x384xi1>
    %141 = arith.extui %140 : vector<1x384xi1> to vector<1x384xi32>
    %142 = arith.sitofp %141 : vector<1x384xi32> to vector<1x384xf32>
    %143 = vector.broadcast %142 : vector<1x384xf32> to vector<8x384xf32>
    %144 = arith.mulf %132, %143 : vector<8x384xf32>
    %cst_118 = arith.constant dense<0.000000e+00> : vector<8xf32>
    %145 = vector.multi_reduction <add>, %144, %cst_118 [1] : vector<8x384xf32> to vector<8xf32>
    %146 = vector.shape_cast %145 : vector<8xf32> to vector<8x1xf32>
    %147 = arith.addf %112, %146 : vector<8x1xf32>
    %148 = arith.mulf %144, %144 : vector<8x384xf32>
    %cst_119 = arith.constant dense<0.000000e+00> : vector<8xf32>
    %149 = vector.multi_reduction <add>, %148, %cst_119 [1] : vector<8x384xf32> to vector<8xf32>
    %150 = vector.shape_cast %149 : vector<8xf32> to vector<8x1xf32>
    %151 = arith.addf %116, %150 : vector<8x1xf32>
    %cst_120 = arith.constant 9.765625E-4 : f32
    %152 = vector.broadcast %cst_120 : f32 to vector<8x1xf32>
    %153 = arith.mulf %147, %152 : vector<8x1xf32>
    %cst_121 = arith.constant 9.765625E-4 : f32
    %154 = vector.broadcast %cst_121 : f32 to vector<8x1xf32>
    %155 = arith.mulf %151, %154 : vector<8x1xf32>
    %156 = arith.mulf %153, %153 : vector<8x1xf32>
    %157 = arith.subf %155, %156 : vector<8x1xf32>
    %cst_122 = arith.constant 0.000000e+00 : f32
    %158 = vector.broadcast %cst_122 : f32 to vector<8x1xf32>
    %159 = arith.maximumf %157, %158 : vector<8x1xf32>
    %c0_123 = arith.constant 0 : index
    %c0_124 = arith.constant 0 : index
    %160 = vector.load %arg4[%c0_123, %c0_124] : memref<8x1xf32, #tpu.memory_space<vmem>>, vector<8x1xf32>
    %cst_125 = arith.constant 9.99999974E-6 : f32
    %161 = vector.broadcast %cst_125 : f32 to vector<8x1xf32>
    %162 = arith.addf %159, %161 : vector<8x1xf32>
    %163 = math.rsqrt %162 : vector<8x1xf32>
    %164 = arith.mulf %160, %163 : vector<8x1xf32>
    %c0_126 = arith.constant 0 : index
    %c0_127 = arith.constant 0 : index
    %165 = vector.load %arg5[%c0_126, %c0_127] : memref<8x1xf32, #tpu.memory_space<vmem>>, vector<8x1xf32>
    %166 = arith.mulf %153, %164 : vector<8x1xf32>
    %167 = arith.subf %165, %166 : vector<8x1xf32>
    %c0_128 = arith.constant 0 : index
    %c0_129 = arith.constant 0 : index
    %c0_130 = arith.constant 0 : index
    %168 = vector.load %arg8[%c0_128, %c0_129, %c0_130] : memref<4x8x384xf32, #tpu.memory_space<vmem>>, vector<1x8x384xf32>
    %169 = vector.shape_cast %168 : vector<1x8x384xf32> to vector<8x384xf32>
    %170 = vector.broadcast %164 : vector<8x1xf32> to vector<8x384xf32>
    %171 = arith.mulf %169, %170 : vector<8x384xf32>
    %172 = vector.broadcast %167 : vector<8x1xf32> to vector<8x384xf32>
    %173 = arith.addf %171, %172 : vector<8x384xf32>
    %cst_131 = arith.constant 0.000000e+00 : f32
    %174 = vector.broadcast %cst_131 : f32 to vector<8x384xf32>
    %175 = arith.maximumf %173, %174 : vector<8x384xf32>
    %c0_132 = arith.constant 0 : index
    %c0_133 = arith.constant 0 : index
    %c0_134 = arith.constant 0 : index
    %c0_135 = arith.constant 0 : index
    %176 = vector.load %arg6[%c0_132, %c0_133, %c0_134, %c0_135] : memref<1x4x8x384xf32, #tpu.memory_space<vmem>>, vector<1x1x8x384xf32>
    %177 = vector.shape_cast %176 : vector<1x1x8x384xf32> to vector<8x384xf32>
    %178 = vector.shape_cast %175 : vector<8x384xf32> to vector<1x1x8x384xf32>
    tpu.vector_store %arg6[%c0_132, %c0_133, %c0_134, %c0_135], %178 {strides = array<i32>} : memref<1x4x8x384xf32, #tpu.memory_space<vmem>>, vector<1x1x8x384xf32>,
    %c1_136 = arith.constant 1 : index
    %c0_137 = arith.constant 0 : index
    %c0_138 = arith.constant 0 : index
    %179 = vector.load %arg8[%c1_136, %c0_137, %c0_138] : memref<4x8x384xf32, #tpu.memory_space<vmem>>, vector<1x8x384xf32>
    %180 = vector.shape_cast %179 : vector<1x8x384xf32> to vector<8x384xf32>
    %181 = vector.broadcast %164 : vector<8x1xf32> to vector<8x384xf32>
    %182 = arith.mulf %180, %181 : vector<8x384xf32>
    %183 = vector.broadcast %167 : vector<8x1xf32> to vector<8x384xf32>
    %184 = arith.addf %182, %183 : vector<8x384xf32>
    %cst_139 = arith.constant 0.000000e+00 : f32
    %185 = vector.broadcast %cst_139 : f32 to vector<8x384xf32>
    %186 = arith.maximumf %184, %185 : vector<8x384xf32>
    %c0_140 = arith.constant 0 : index
    %c1_141 = arith.constant 1 : index
    %c0_142 = arith.constant 0 : index
    %c0_143 = arith.constant 0 : index
    %187 = vector.load %arg6[%c0_140, %c1_141, %c0_142, %c0_143] : memref<1x4x8x384xf32, #tpu.memory_space<vmem>>, vector<1x1x8x384xf32>
    %188 = vector.shape_cast %187 : vector<1x1x8x384xf32> to vector<8x384xf32>
    %189 = vector.shape_cast %186 : vector<8x384xf32> to vector<1x1x8x384xf32>
    tpu.vector_store %arg6[%c0_140, %c1_141, %c0_142, %c0_143], %189 {strides = array<i32>} : memref<1x4x8x384xf32, #tpu.memory_space<vmem>>, vector<1x1x8x384xf32>,
    %c2_144 = arith.constant 2 : index
    %c0_145 = arith.constant 0 : index
    %c0_146 = arith.constant 0 : index
    %190 = vector.load %arg8[%c2_144, %c0_145, %c0_146] : memref<4x8x384xf32, #tpu.memory_space<vmem>>, vector<1x8x384xf32>
    %191 = vector.shape_cast %190 : vector<1x8x384xf32> to vector<8x384xf32>
    %192 = vector.broadcast %164 : vector<8x1xf32> to vector<8x384xf32>
    %193 = arith.mulf %191, %192 : vector<8x384xf32>
    %194 = vector.broadcast %167 : vector<8x1xf32> to vector<8x384xf32>
    %195 = arith.addf %193, %194 : vector<8x384xf32>
    %cst_147 = arith.constant 0.000000e+00 : f32
    %196 = vector.broadcast %cst_147 : f32 to vector<8x384xf32>
    %197 = arith.maximumf %195, %196 : vector<8x384xf32>
    %c0_148 = arith.constant 0 : index
    %c2_149 = arith.constant 2 : index
    %c0_150 = arith.constant 0 : index
    %c0_151 = arith.constant 0 : index
    %198 = vector.load %arg6[%c0_148, %c2_149, %c0_150, %c0_151] : memref<1x4x8x384xf32, #tpu.memory_space<vmem>>, vector<1x1x8x384xf32>
    %199 = vector.shape_cast %198 : vector<1x1x8x384xf32> to vector<8x384xf32>
    %200 = vector.shape_cast %197 : vector<8x384xf32> to vector<1x1x8x384xf32>
    tpu.vector_store %arg6[%c0_148, %c2_149, %c0_150, %c0_151], %200 {strides = array<i32>} : memref<1x4x8x384xf32, #tpu.memory_space<vmem>>, vector<1x1x8x384xf32>,
    %c3_152 = arith.constant 3 : index
    %c0_153 = arith.constant 0 : index
    %c0_154 = arith.constant 0 : index
    %201 = vector.load %arg8[%c3_152, %c0_153, %c0_154] : memref<4x8x384xf32, #tpu.memory_space<vmem>>, vector<1x8x384xf32>
    %202 = vector.shape_cast %201 : vector<1x8x384xf32> to vector<8x384xf32>
    %203 = vector.broadcast %164 : vector<8x1xf32> to vector<8x384xf32>
    %204 = arith.mulf %202, %203 : vector<8x384xf32>
    %205 = vector.broadcast %167 : vector<8x1xf32> to vector<8x384xf32>
    %206 = arith.addf %204, %205 : vector<8x384xf32>
    %cst_155 = arith.constant 0.000000e+00 : f32
    %207 = vector.broadcast %cst_155 : f32 to vector<8x384xf32>
    %208 = arith.maximumf %206, %207 : vector<8x384xf32>
    %c0_156 = arith.constant 0 : index
    %c3_157 = arith.constant 3 : index
    %c0_158 = arith.constant 0 : index
    %c0_159 = arith.constant 0 : index
    %209 = vector.load %arg6[%c0_156, %c3_157, %c0_158, %c0_159] : memref<1x4x8x384xf32, #tpu.memory_space<vmem>>, vector<1x1x8x384xf32>
    %210 = vector.shape_cast %209 : vector<1x1x8x384xf32> to vector<8x384xf32>
    %211 = vector.shape_cast %208 : vector<8x384xf32> to vector<1x1x8x384xf32>
    tpu.vector_store %arg6[%c0_156, %c3_157, %c0_158, %c0_159], %211 {strides = array<i32>} : memref<1x4x8x384xf32, #tpu.memory_space<vmem>>, vector<1x1x8x384xf32>,
    return
  }
  func.func @transform_0(%arg0: i32, %arg1: i32) -> (i32, i32, i32) {
    %c0_i32 = arith.constant 0 : i32
    %c0_i32_0 = arith.constant 0 : i32
    %c0_i32_1 = arith.constant 0 : i32
    return %arg0, %c0_i32, %c0_i32_0 : i32, i32, i32
  }
  func.func @transform_1(%arg0: i32, %arg1: i32) -> (i32, i32, i32) {
    %c0_i32 = arith.constant 0 : i32
    %c0_i32_0 = arith.constant 0 : i32
    %c0_i32_1 = arith.constant 0 : i32
    return %c0_i32, %arg1, %c0_i32_0 : i32, i32, i32
  }
  func.func @transform_2(%arg0: i32, %arg1: i32) -> (i32, i32) {
    %c0_i32 = arith.constant 0 : i32
    %c0_i32_0 = arith.constant 0 : i32
    return %arg1, %c0_i32 : i32, i32
  }
  func.func @transform_3(%arg0: i32, %arg1: i32) -> (i32, i32) {
    %c0_i32 = arith.constant 0 : i32
    %c0_i32_0 = arith.constant 0 : i32
    return %arg1, %c0_i32 : i32, i32
  }
  func.func @transform_4(%arg0: i32, %arg1: i32) -> (i32, i32, i32, i32) {
    %c0_i32 = arith.constant 0 : i32
    %c0_i32_0 = arith.constant 0 : i32
    %c0_i32_1 = arith.constant 0 : i32
    return %arg0, %c0_i32, %arg1, %c0_i32_0 : i32, i32, i32, i32
  }
}

</mosaic_0001>

<bundles_post_ra>
// kernel: tpu_custom_call.1
= control target key start
LH: loop header
LB: loop body
LE: loop exit
PB: predicated region body
PF: predicated region fallthrough
CT: control target
= control target key end

     0   :  { %9 = vsyncpa [#allocation5], 0  ;;  %s2452_s0 = inlined_call_operand.hbm [shape: f32[2,4,512], index: 0, kind: input, shape index: {}]   ;;  %s2453_s1 = inlined_call_operand.hbm [shape: f32[4,8,16], index: 1, kind: input, shape index: {}]   ;;  %s2454_s2 = inlined_call_operand.vmem [shape: f32[8,1], index: 2, kind: input, shape index: {}]   ;;  %s2455_s3 = inlined_call_operand.vmem [shape: f32[8,1], index: 3, kind: input, shape index: {}]   ;;  %s2456_s4 = inlined_call_operand.hbm [shape: f32[2,4,8,384], index: 4, kind: output, shape index: {}]  }
   0x1   :  { %11 = vsyncpa [#allocation5 + $0x1], 0 }
   0x2   :  { %12 = vsyncpa [#allocation8], 0 }
   0x3   :  { %13 = vsyncpa [#allocation6], 0 }
   0x4   :  { %15 = vsyncpa [#allocation6 + $0x1], 0  ;;  %s2000_s15 = smov 0   ;;  %s2002_s16 = smov 0  }
   0x5   :  { %s2004_s17 = smov 0   ;;  %s2006_s18 = smov 0  }
   0x6   :  { %s2008_s19 = smov 0   ;;  %s2010_s20 = smov 0  }
   0x7 LB: > { %s1599_s21 = sadd.s32 4294967295, %s1954_s20   ;;  %s1600_s22 = sadd.s32 4294967294, %s1954_s20   ;;  %s1954_s20 = sphi %s2010_s20, %s21_s20   ;;  %s1950_s19 = sphi %s2008_s19, %s2480_s19   ;;  %s1946_s18 = sphi %s2006_s18, %s2479_s18   ;;  %s1942_s17 = sphi %s2004_s17, %s2478_s17   ;;  %s1938_s16 = sphi %s2002_s16, %s2477_s16   ;;  %s1934_s15 = sphi %s2000_s15, %s2476_s15  }
   0x8   : > { %p53_p0 = scmp.ne.s32.totalorder %s1938_s16, %s1934_s15  ;;  %p2034_p1 = scmp.eq.s32.totalorder %s1599_s21, 0 }
   0x9   : > { %p2038_p2 = scmp.eq.s32.totalorder %s1599_s21, 1  ;;  %p163_p3 = scmp.eq.s32.totalorder %s1600_s22, 1 }
   0xa   : > { %s2461_s23 = scalar_select %p2034_p1, 1, 0 }
   0xb   : > { %s2462_s24 = scalar_select %p2038_p2, 1, 0 }
   0xc   : > { %p2044_p4 = por %p2034_p1, %p53_p0  ;;  %p1601_p5 = scmp.ge.s32.totalorder %s1954_s20, 1 }
   0xd   : > { %p2049_p6 = por %p163_p3, %p53_p0  ;;  %p170_p7 = scmp.lt.s32.totalorder %s1954_s20, 3 }
   0xe   : > { %s2463_s25 = scalar_select %p2044_p4, 1, 0 }
   0xf   : > { %s2464_s26 = scalar_select %p2049_p6, 1, 0 }
  0x10   : > { %p2054_p8 = pnand %p1601_p5, %p170_p7  ;;  %s1956_s28 = smov [#allocation7]  }
  0x11   : > { %s184_s29 = sshll.u32 %s1956_s28, 4  ;;  %s33_s5 = sadd.s32 1, %s1950_s19  ;;  %s185_s29 = int_to_ptr.vmem [resolvable:$true] %s184_s29 }
  0x12   : > { %s2465_s27 = scalar_select %p2054_p8, 1, 0 }
  0x13   : > { %p1720_p9 = pneg %p2054_p8  ;;  %s1810_s8 = scalar_lea.hbm %s2453_s1, 512 }
  0x14   : > { %p1811_p12 = scmp.ne.s32.totalorder %s2453_s1, %s1810_s8  ;;  %p1817_p5 = scmp.lt.u32.totalorder %s1810_s8, %s2453_s1 }
  0x15   : > { %p2063_p11 = pnand %p1720_p9, %p2034_p1 }
  0x17   : > { %p1812_p13 = pneg %p2063_p11 }
  0x19   : > { %p1813_p0 = pnand %p1812_p13, %p1811_p12 }
  0x1b   : > { %p1814_p3 = pneg %p1813_p0 }
  0x1d   : > { %p1819_p7 = pnand %p1817_p5, %p1814_p3 }
  0x1f   : > { %1822 = shalt.err (!%p1819_p7)
}
  0x20   : > { %s1823_s13 = scalar_lea.vmem %s185_s29, 512  ;;  %p1831_p1 = scmp.lt.s32.totalorder %s185_s29, %s185_s29 }
  0x21   : > { %p1824_p9 = scmp.ne.s32.totalorder %s185_s29, %s1823_s13  ;;  %p1832_p4 = scmp.lt.s32.totalorder %s1823_s13, %s1823_s13 }
  0x23   : > { %p1826_p10 = pnand %p1824_p9, %p1812_p13  ;;  %p1833_p8 = por %p1832_p4, %p1831_p1 }
  0x25   : > { %p1827_p6 = pneg %p1826_p10 }
  0x27   : > { %p1834_p2 = pnand %p1833_p8, %p1827_p6 }
  0x29   : > { %1837 = shalt.err (!%p1834_p2)
}
  0x2a   : > { %s1957_s14 = smov 128   ;;  %s1958_s21 = smov 8  }
  0x2b   : > { %1723 = dma.hbm_to_vmem [thread:$0]  (!%p2063_p11), %s2453_s1, 512, %s185_s29, [#allocation8], %s1957_s14, %s1957_s14, %s1958_s21  }
  0x2c   : > { %p35_p1 = scmp.ge.s32.totalorder %s33_s5, 2  ;;  %s40_s6 = sadd.s32 1, %s1942_s17 }
  0x2d   : > { %p47_p2 = scmp.ne.s32.totalorder %s1942_s17, %s1938_s16  ;;  %p48_p4 = scmp.eq.s32.totalorder %s1954_s20, 0 }
  0x2e   : > { %s2482_s5 = smov (%p35_p1, %s33_s5), 0  ;;  %p2468_p8 = scmp.ne.s32.totalorder %s2462_s24, 0 }
  0x2f   : > { %p2090_p6 = por %p48_p4, %p47_p2  ;;  %s37_s30 = ssub.s32 %s1950_s19, %s2482_s5 }
  0x30   : > { %p2096_p10 = por %p2468_p8, %p47_p2  ;;  %p1733_p12 = scmp.lt.s32.totalorder %s1954_s20, 2 }
  0x31   : > { %p38_p11 = scmp.eq.s32.totalorder %s37_s30, 0  ;;  %s212_s29 = sand.u32 1, %s1942_s17  }
  0x32   : > { %s1606_s9 = sshll.u32 %s212_s29, 4  ;;  %s1635_s11 = sshll.u32 %s1950_s19, 8 }
  0x33   : > { %s2105_s10 = scalar_select %p38_p11, %s1942_s17, %s40_s6  }
  0x34   : > { %s2111_s14 = scalar_lea.hbm %s2452_s0, %s1635_s11  ;;  %s216_s24 = scalar_lea.vmem [#allocation4], %s1606_s9 }
  0x35   : > { %s224_s21 = sshll.u32 %s216_s24, 4  ;;  %p2117_p13 = pnand %p1733_p12, %p2090_p6  ;;  %s2113_s21 = int_to_ptr.vmem [resolvable:$true] %s224_s21 }
  0x36   : > { %s213_s28 = scalar_lea.sflag [#allocation5], %s212_s29  ;;  %s1838_s6 = scalar_lea.hbm %s2111_s14, 256 }
  0x37   : > { %p1839_p0 = scmp.ne.s32.totalorder %s2111_s14, %s1838_s6  ;;  %p1840_p3 = pneg %p2117_p13 }
  0x38   : > { %s1843_s11 = scalar_lea.hbm %s2452_s0, 512  ;;  %p1844_p9 = scmp.lt.u32.totalorder %s2111_s14, %s2452_s0 }
  0x39   : > { %p1841_p5 = pnand %p1840_p3, %p1839_p0  ;;  %p1845_p1 = scmp.lt.u32.totalorder %s1843_s11, %s1838_s6 }
  0x3a   : > { %p1847_p4 = scmp.lt.u32.totalorder %s1838_s6, %s2111_s14 }
  0x3b   : > { %p1842_p7 = pneg %p1841_p5  ;;  %p1846_p2 = por %p1845_p1, %p1844_p9 }
  0x3d   : > { %p1848_p6 = por %p1847_p4, %p1846_p2 }
  0x3f   : > { %p1849_p8 = pnand %p1848_p6, %p1842_p7 }
  0x41   : > { %1852 = shalt.err (!%p1849_p8)
}
  0x42   : > { %s1853_s29 = scalar_lea.vmem %s2113_s21, 256  ;;  %s1959_s13 = smov [#allocation4]  }
  0x43   : > { %p1854_p12 = scmp.ne.s32.totalorder %s2113_s21, %s1853_s29  ;;  %s1858_s24 = sshll.u32 %s1959_s13, 4  ;;  %s1859_s24 = int_to_ptr.vmem [resolvable:$false] %s1858_s24 }
  0x44   : > { %s1860_s30 = scalar_lea.vmem %s1859_s24, 512  ;;  %p1861_p5 = scmp.lt.s32.totalorder %s2113_s21, %s1859_s24 }
  0x45   : > { %p1856_p11 = pnand %p1854_p12, %p1840_p3  ;;  %p1862_p9 = scmp.lt.s32.totalorder %s1860_s30, %s1853_s29 }
  0x47   : > { %p1857_p0 = pneg %p1856_p11  ;;  %p1863_p1 = por %p1862_p9, %p1861_p5 }
  0x49   : > { %p1864_p2 = pnand %p1863_p1, %p1857_p0 }
  0x4b   : > { %1867 = shalt.err (!%p1864_p2)
}
  0x4c   : > { %1727 = dma.hbm_to_vmem [thread:$0]  (!%p2117_p13), %s2111_s14, 256, %s2113_s21, %s213_s28  }
  0x4d   : > { %p2471_p7 = scmp.ne.s32.totalorder %s2465_s27, 0 }
  0x4e   : > { %s2149_s6 = sand.u32 (!%p2471_p7), 1, %s1938_s16   ;;  %p2472_p3 = scmp.ne.s32.totalorder (!%p2471_p7), %s2463_s25, 0 }
  0x4f   : > { %233 = sbr.rel (%p2471_p7) target bundleno = 875 (0x36b), region = 36  ;;  %s1610_s9 = sshll.u32 (!%p2471_p7), %s2149_s6, 4 }
  0x50   : > { %s236_s11 = scalar_lea.sflag (!%p2471_p7), [#allocation5], %s2149_s6  ;;  %s239_s7 = scalar_lea.vmem (!%p2471_p7), [#allocation4], %s1610_s9 }
  0x56   : > { %1921 = dma.done.wait (%p2472_p3), %s236_s11, 256  }
  0x57   : > { %1923 = vsyncadd (%p2472_p3), %s236_s11, 4294967040  ;;  %p2473_p4 = scmp.ne.s32.totalorder %s2461_s23, 0 }
  0x59   : > { %1925 = dma.done.wait (%p2473_p4), [#allocation8], 512  }
  0x5a   : > { %1927 = vsyncadd (%p2473_p4), [#allocation8], 4294966784  ;;  %v2161_v0 = vld [vmem:[%s239_s7] sm:$0xff]  ;;  %v2163_v1 = vld [vmem:[%s239_s7 + $0x8] sm:$0xff]  ;;  %s1960_s27 = smov 110   ;;  %s1961_s25 = smov 109  }
  0x5b   : > { %338 = vrot.lane.b32.xlu1 %v2161_v0, %s1960_s27  ;;  %v2169_v2 = vcombine.low %v2161_v0, %v2161_v0  ;;  %316 = vrot.lane.b32.xlu0 %v2163_v1, %s1961_s25  ;;  %v2175_v3 = vcombine.high %v2161_v0, %v2161_v0  ;;  %387 = vst [vmem:[#allocation2 + $0x20] sm:$0xf0] %v2161_v0  ;;  %s1962_s23 = smov 127   ;;  %v1807_v5 = vld [vmem:[%s239_s7 + $0x8] ss:$0 sps:$4 sm:$0xff]   ;;  %v1963_v7 = vmov 0.0|0.0  }
  0x5c   : > { %v335_v4 = vcombine.low %v2163_v1, %v2163_v1  ;;  %388 = vst [vmem:[#allocation2 + $0x28] sm:$0xf0] %v1807_v5  ;;  %v2190_v6 = vcombine.high %v2163_v1, %v2163_v1  ;;  %1680 = vmatprep.subr.bf16.mxu1 %v1963_v7  ;;  %s1964_s14 = smov 108   ;;  %s1965_s21 = smov 126   ;;  %v1966_v8 = vmov 0.0   ;;  %vm1967_vm0 = vmmov 0  }
  0x5d   : > { %386 = vst [vmem:[#allocation2 + $0x18] sm:$0xf0] %v2169_v2  ;;  %464 = vmatprep.mubr.f32.mxu0 %v1966_v8  ;;  %1652 = vmatprep.mubr.msk.f32.mxu1 %vm1967_vm0, %v1966_v8  ;;  %s1968_s22 = smov 91   ;;  %s1969_s28 = smov 92   ;;  %vm320_vm1 = vcmask 891904   ;;  %vm344_vm2 = vcmask 900096  }
  0x5e   : > { %s1970_s12 = smov 90   ;;  %vm368_vm3 = vcmask 1039360   ;;  %vm589_vm4 = vcmask 883712   ;;  %v389_v41 = vld [vmem:[#allocation7] sm:$0xff]  ;;  %vm396_vm5 = vcmask 130048   ;;  %vm636_vm6 = vcmask 1031168  }
  0x5f   : > { %364 = vrot.lane.b32.xlu1 %v2163_v1, %s1962_s23  ;;  %314 = vrot.lane.b32.xlu0 %v2175_v3, %s1961_s25  ;;  %vm855_vm7 = vcmask 744448   ;;  %vm879_vm8 = vcmask 752640   ;;  %vm1121_vm9 = vcmask 736256   ;;  %s1704_s9 = smul.u32 96, %s2149_s6 }
  0x60   : > { %s1711_s11 = smul.u32 1536, %s1946_s18 }
  0x61   : > { %s275_s7 = scalar_lea.vmem [#allocation9], %s1704_s9 }
  0x63   : > { %340 = vrot.lane.b32.xlu1 %v335_v4, %s1960_s27  ;;  %362 = vrot.lane.b32.xlu0 %v2175_v3, %s1962_s23 }
  0x67   : > { %336 = vrot.lane.b32.xlu1 %v2169_v2, %s1960_s27  ;;  %312 = vrot.lane.b32.xlu0 %v2161_v0, %s1961_s25 }
  0x6b   : > { %318 = vrot.lane.b32.xlu1 %v2190_v6, %s1961_s25  ;;  %360 = vrot.lane.b32.xlu0 %v2161_v0, %s1962_s23 }
  0x6f   : > { %366 = vrot.lane.b32.xlu1 %v2190_v6, %s1962_s23  ;;  %342 = vrot.lane.b32.xlu0 %v2163_v1, %s1960_s27 }
  0x73   : > { %585 = vrot.lane.b32.xlu1 %v2163_v1, %s1964_s14  ;;  %583 = vrot.lane.b32.xlu0 %v2175_v3, %s1964_s14 }
  0x77   : > { %609 = vrot.lane.b32.xlu1 %v335_v4, %s1961_s25  ;;  %607 = vrot.lane.b32.xlu0 %v2161_v0, %s1961_s25 }
  0x7b   : > { %632 = vrot.lane.b32.xlu1 %v2163_v1, %s1965_s21  ;;  %630 = vrot.lane.b32.xlu0 %v2175_v3, %s1965_s21 }
  0x7f   : > { %656 = vrot.lane.b32.xlu1 %v335_v4, %s1962_s23  ;;  %654 = vrot.lane.b32.xlu0 %v2161_v0, %s1962_s23 }
  0x83   : > { %605 = vrot.lane.b32.xlu1 %v2169_v2, %s1961_s25  ;;  %581 = vrot.lane.b32.xlu0 %v2161_v0, %s1964_s14 }
  0x87   : > { %652 = vrot.lane.b32.xlu1 %v2169_v2, %s1962_s23  ;;  %628 = vrot.lane.b32.xlu0 %v2161_v0, %s1965_s21 }
  0x8b   : > { %611 = vrot.lane.b32.xlu1 %v2163_v1, %s1961_s25  ;;  %587 = vrot.lane.b32.xlu0 %v2190_v6, %s1964_s14 }
  0x8f   : > { %658 = vrot.lane.b32.xlu1 %v2163_v1, %s1962_s23  ;;  %634 = vrot.lane.b32.xlu0 %v2190_v6, %s1965_s21  ;;  %s2401_s23 = scalar_lea.hbm %s2456_s4, %s1711_s11 }
  0x93   : > { %851 = vrot.lane.b32.xlu1 %v2163_v1, %s1968_s22  ;;  %849 = vrot.lane.b32.xlu0 %v2175_v3, %s1968_s22 }
  0x97   : > { %875 = vrot.lane.b32.xlu1 %v335_v4, %s1969_s28  ;;  %873 = vrot.lane.b32.xlu0 %v2161_v0, %s1969_s28 }
  0x9b   : > { %899 = vrot.lane.b32.xlu1 %v2163_v1, %s1961_s25  ;;  %897 = vrot.lane.b32.xlu0 %v2175_v3, %s1961_s25 }
  0x9f   : > { %922 = vrot.lane.b32.xlu1 %v335_v4, %s1960_s27  ;;  %920 = vrot.lane.b32.xlu0 %v2161_v0, %s1960_s27 }
  0xa3   : > { %871 = vrot.lane.b32.xlu1 %v2169_v2, %s1969_s28  ;;  %847 = vrot.lane.b32.xlu0 %v2161_v0, %s1968_s22 }
  0xa7   : > { %918 = vrot.lane.b32.xlu1 %v2169_v2, %s1960_s27  ;;  %895 = vrot.lane.b32.xlu0 %v2161_v0, %s1961_s25 }
  0xab   : > { %877 = vrot.lane.b32.xlu1 %v2163_v1, %s1969_s28  ;;  %853 = vrot.lane.b32.xlu0 %v2190_v6, %s1968_s22 }
  0xaf   : > { %924 = vrot.lane.b32.xlu1 %v2163_v1, %s1960_s27  ;;  %901 = vrot.lane.b32.xlu0 %v2190_v6, %s1961_s25  ;;  %s1473_s27 = sshll.u32 %s275_s7, 4  ;;  %s2403_s27 = int_to_ptr.vmem [resolvable:$true] %s1473_s27 }
  0xb0   : > { %s1868_s21 = scalar_lea.vmem %s2403_s27, 1536 }
  0xb1   : > { %p1869_p13 = scmp.ne.s32.totalorder %s2403_s27, %s1868_s21 }
  0xb3   : > { %1117 = vrot.lane.b32.xlu1 %v2163_v1, %s1970_s12  ;;  %1115 = vrot.lane.b32.xlu0 %v2175_v3, %s1970_s12  ;;  %p1870_p6 = pnand %p1869_p13, %p2096_p10 }
  0xb5   : > { %p1871_p8 = pneg %p1870_p6 }
  0xb7   : > { %1141 = vrot.lane.b32.xlu1 %v335_v4, %s1968_s22  ;;  %1139 = vrot.lane.b32.xlu0 %v2161_v0, %s1968_s22 }
  0xbb   : > { %1164 = vrot.lane.b32.xlu1 %v2163_v1, %s1964_s14  ;;  %1162 = vrot.lane.b32.xlu0 %v2175_v3, %s1964_s14 }
  0xbf   : > { %1187 = vrot.lane.b32.xlu1 %v335_v4, %s1961_s25  ;;  %1185 = vrot.lane.b32.xlu0 %v2161_v0, %s1961_s25 }
  0xc3   : > { %1137 = vrot.lane.b32.xlu1 %v2169_v2, %s1968_s22  ;;  %1113 = vrot.lane.b32.xlu0 %v2161_v0, %s1970_s12 }
  0xc7   : > { %1183 = vrot.lane.b32.xlu1 %v2169_v2, %s1961_s25  ;;  %1160 = vrot.lane.b32.xlu0 %v2161_v0, %s1964_s14 }
  0xcb   : > { %1143 = vrot.lane.b32.xlu1 %v2163_v1, %s1968_s22  ;;  %1119 = vrot.lane.b32.xlu0 %v2190_v6, %s1970_s12  ;;  %s1972_s22 = smov [#allocation9]  }
  0xcc   : > { %s1872_s28 = sshll.u32 %s1972_s22, 4  ;;  %s1873_s28 = int_to_ptr.vmem [resolvable:$false] %s1872_s28 }
  0xcd   : > { %v339_v9 = vpop.permute.xlu1 %338  ;;  %v317_v10 = vpop.permute.xlu0 %316  ;;  %s1874_s12 = scalar_lea.vmem %s1873_s28, 3072  ;;  %p1875_p12 = scmp.lt.s32.totalorder %s2403_s27, %s1873_s28 }
  0xce   : > { %p1876_p11 = scmp.lt.s32.totalorder %s1874_s12, %s1868_s21 }
  0xcf   : > { %1189 = vrot.lane.b32.xlu1 %v2163_v1, %s1961_s25  ;;  %1166 = vrot.lane.b32.xlu0 %v2190_v6, %s1964_s14  ;;  %s1458_s14 = scalar_lea.sflag [#allocation6], %s2149_s6 }
  0xd0   : > { %p1877_p0 = por %p1876_p11, %p1875_p12 }
  0xd1   : > { %v365_v11 = vpop.permute.xlu1 %364  ;;  %v315_v12 = vpop.permute.xlu0 %314 }
  0xd2   : > { %v322_v13 = vsel %vm320_vm1, %v315_v12, %v317_v10  ;;  %p1878_p5 = pnand %p1877_p0, %p1871_p8 }
  0xd3   : > { %328 = vst [vmem:[#allocation2 + $0x8] sm:$0xf] %v322_v13 }
  0xd5   : > { %v341_v14 = vpop.permute.xlu1 %340  ;;  %v363_v15 = vpop.permute.xlu0 %362 }
  0xd6   : > { %v346_v16 = vsel %vm344_vm2, %v339_v9, %v341_v14  ;;  %v370_v17 = vsel %vm368_vm3, %v363_v15, %v365_v11 }
  0xd7   : > { %352 = vst [vmem:[#allocation2 + $0x8] sm:$0xf0] %v346_v16  ;;  %376 = vst [vmem:[#allocation2 + $0x20] sm:$0xf] %v370_v17 }
  0xd9   : > { %v337_v18 = vpop.permute.xlu1 %336  ;;  %v313_v19 = vpop.permute.xlu0 %312 }
  0xda   : > { %v345_v20 = vsel %vm344_vm2, %v337_v18, %v339_v9  ;;  %v321_v21 = vsel %vm320_vm1, %v313_v19, %v315_v12 }
  0xdb   : > { %351 = vst [vmem:[#allocation2] sm:$0xf0] %v345_v20  ;;  %327 = vst [vmem:[#allocation2] sm:$0xf] %v321_v21 }
  0xdd   : > { %v319_v22 = vpop.permute.xlu1 %318  ;;  %v361_v23 = vpop.permute.xlu0 %360 }
  0xde   : > { %v323_v24 = vsel %vm320_vm1, %v317_v10, %v319_v22  ;;  %v369_v25 = vsel %vm368_vm3, %v361_v23, %v363_v15  ;;  %v391_v26 = vld [vmem:[#allocation2 + $0x8] sm:$0xff]  ;;  %v394_v27 = vld [vmem:[#allocation2 + $0x20] sm:$0xff] }
  0xdf   : > { %329 = vst [vmem:[#allocation2 + $0x10] sm:$0xf] %v323_v24  ;;  %375 = vst [vmem:[#allocation2 + $0x18] sm:$0xf] %v369_v25  ;;  %v1676_v28 = vpack.c.bf16 %v394_v27, %v391_v26 }
  0xe1   : > { %v367_v29 = vpop.permute.xlu1 %366  ;;  %1677 = vmatprep.subr.bf16.mxu0 %v1676_v28  ;;  %v343_v30 = vpop.permute.xlu0 %342 }
  0xe2   : > { %v371_v31 = vsel %vm368_vm3, %v365_v11, %v367_v29  ;;  %v347_v32 = vsel %vm344_vm2, %v341_v14, %v343_v30  ;;  %v390_v36 = vld [vmem:[#allocation2] sm:$0xff]  ;;  %v670_v14 = vld [vmem:[#allocation7 + $0x8] sm:$0xff] }
  0xe3   : > { %377 = vst [vmem:[#allocation2 + $0x28] sm:$0xf] %v371_v31  ;;  %353 = vst [vmem:[#allocation2 + $0x10] sm:$0xf0] %v347_v32 }
  0xe5   : > { %v586_v33 = vpop.permute.xlu1 %585  ;;  %v584_v34 = vpop.permute.xlu0 %583 }
  0xe6   : > { %v591_v35 = vsel %vm589_vm4, %v584_v34, %v586_v33  ;;  %v393_v37 = vld [vmem:[#allocation2 + $0x18] sm:$0xff] }
  0xe7   : > { %597 = vst [vmem:[#allocation2 + $0x8] sm:$0xf] %v591_v35  ;;  %v1678_v38 = vpack.c.bf16 %v393_v37, %v390_v36 }
  0xe9   : > { %v610_v39 = vpop.permute.xlu1 %609  ;;  %1679 = vmatpush1.bf16.msra.mxu0 %v1678_v38  ;;  %v608_v40 = vpop.permute.xlu0 %607 }
  0xea   : > { %v614_v42 = vsel %vm320_vm1, %v608_v40, %v610_v39  ;;  %v392_v43 = vld [vmem:[#allocation2 + $0x10] sm:$0xff]  ;;  %v395_v44 = vld [vmem:[#allocation2 + $0x28] sm:$0xff] }
  0xeb   : > { %620 = vst [vmem:[#allocation2 + $0x8] sm:$0xf0] %v614_v42  ;;  %v1681_v45 = vpack.c.bf16 %v395_v44, %v392_v43 }
  0xec   : > { %1612 = vmatmul.mubr.msk.f32.vlgmr.msra.gmra.mrb[0].mxu0 %vm396_vm5, %v389_v41 }
  0xed   : > { %v633_v46 = vpop.permute.xlu1 %632  ;;  %1682 = vmatpush3.bf16.msra.mxu1 %v1681_v45  ;;  %v631_v47 = vpop.permute.xlu0 %630  ;;  %744 = vmatprep.mubr.f32.mxu0 %v1966_v8 }
  0xee   : > { %v638_v48 = vsel %vm636_vm6, %v631_v47, %v633_v46  ;;  %1687 = vmatprep.subr.bf16.mxu1 %v1963_v7 }
  0xef   : > { %644 = vst [vmem:[#allocation2 + $0x20] sm:$0xf] %v638_v48 }
  0xf0   : > { %1653 = vmatmul.mubr.msk.f32.vlgmr.msra.gmra.mrb[0].mxu1 %vm396_vm5, %v389_v41 }
  0xf1   : > { %v657_v49 = vpop.permute.xlu1 %656  ;;  %v655_v50 = vpop.permute.xlu0 %654  ;;  %1659 = vmatprep.mubr.msk.f32.mxu1 %vm1967_vm0, %v1966_v8 }
  0xf2   : > { %v661_v51 = vsel %vm368_vm3, %v655_v50, %v657_v49  ;;  %v672_v60 = vld [vmem:[#allocation2 + $0x8] sm:$0xff] }
  0xf3   : > { %667 = vst [vmem:[#allocation2 + $0x20] sm:$0xf0] %v661_v51 }
  0xf5   : > { %v606_v52 = vpop.permute.xlu1 %605  ;;  %v582_v53 = vpop.permute.xlu0 %581 }
  0xf6   : > { %v613_v54 = vsel %vm320_vm1, %v606_v52, %v608_v40  ;;  %v590_v55 = vsel %vm589_vm4, %v582_v53, %v584_v34  ;;  %v936_v52 = vld [vmem:[#allocation7 + $0x10] sm:$0xff] }
  0xf7   : > { %619 = vst [vmem:[#allocation2] sm:$0xf0] %v613_v54  ;;  %596 = vst [vmem:[#allocation2] sm:$0xf] %v590_v55 }
  0xf9   : > { %v653_v56 = vpop.permute.xlu1 %652  ;;  %v629_v57 = vpop.permute.xlu0 %628 }
  0xfa   : > { %v660_v58 = vsel %vm368_vm3, %v653_v56, %v655_v50  ;;  %v637_v59 = vsel %vm636_vm6, %v629_v57, %v631_v47  ;;  %v675_v61 = vld [vmem:[#allocation2 + $0x20] sm:$0xff] }
  0xfb   : > { %666 = vst [vmem:[#allocation2 + $0x18] sm:$0xf0] %v660_v58  ;;  %643 = vst [vmem:[#allocation2 + $0x18] sm:$0xf] %v637_v59  ;;  %v1683_v62 = vpack.c.bf16 %v675_v61, %v672_v60 }
  0xfd   : > { %v612_v63 = vpop.permute.xlu1 %611  ;;  %1684 = vmatprep.subr.bf16.mxu0 %v1683_v62  ;;  %v588_v0 = vpop.permute.xlu0 %587 }
  0xfe   : > { %v615_v1 = vsel %vm320_vm1, %v610_v39, %v612_v63  ;;  %v592_v2 = vsel %vm589_vm4, %v586_v33, %v588_v0  ;;  %v671_v9 = vld [vmem:[#allocation2] sm:$0xff] }
  0xff   : > { %621 = vst [vmem:[#allocation2 + $0x10] sm:$0xf0] %v615_v1  ;;  %598 = vst [vmem:[#allocation2 + $0x10] sm:$0xf] %v592_v2 }
 0x101   : > { %v659_v3 = vpop.permute.xlu1 %658  ;;  %v635_v4 = vpop.permute.xlu0 %634 }
 0x102   : > { %v662_v5 = vsel %vm368_vm3, %v657_v49, %v659_v3  ;;  %v639_v6 = vsel %vm636_vm6, %v633_v46, %v635_v4  ;;  %v674_v10 = vld [vmem:[#allocation2 + $0x18] sm:$0xff] }
 0x103   : > { %668 = vst [vmem:[#allocation2 + $0x28] sm:$0xf0] %v662_v5  ;;  %645 = vst [vmem:[#allocation2 + $0x28] sm:$0xf] %v639_v6  ;;  %v1685_v11 = vpack.c.bf16 %v674_v10, %v671_v9 }
 0x105   : > { %v852_v12 = vpop.permute.xlu1 %851  ;;  %1686 = vmatpush1.bf16.msra.mxu0 %v1685_v11  ;;  %v850_v13 = vpop.permute.xlu0 %849 }
 0x106   : > { %v857_v15 = vsel %vm855_vm7, %v850_v13, %v852_v12  ;;  %v673_v19 = vld [vmem:[#allocation2 + $0x10] sm:$0xff] }
 0x107   : > { %863 = vst [vmem:[#allocation2 + $0x8] sm:$0xf] %v857_v15 }
 0x108   : > { %1617 = vmatmul.mubr.msk.f32.vlgmr.msra.gmra.mrb[2].mxu0 %vm396_vm5, %v670_v14 }
 0x109   : > { %v876_v16 = vpop.permute.xlu1 %875  ;;  %v874_v17 = vpop.permute.xlu0 %873  ;;  %1010 = vmatprep.mubr.f32.mxu0 %v1966_v8 }
 0x10a   : > { %v881_v18 = vsel %vm879_vm8, %v874_v17, %v876_v16  ;;  %v676_v20 = vld [vmem:[#allocation2 + $0x28] sm:$0xff] }
 0x10b   : > { %887 = vst [vmem:[#allocation2 + $0x8] sm:$0xf0] %v881_v18  ;;  %v1688_v21 = vpack.c.bf16 %v676_v20, %v673_v19 }
 0x10d   : > { %v900_v22 = vpop.permute.xlu1 %899  ;;  %1689 = vmatpush3.bf16.msra.mxu1 %v1688_v21  ;;  %v898_v23 = vpop.permute.xlu0 %897 }
 0x10e   : > { %v904_v24 = vsel %vm320_vm1, %v898_v23, %v900_v22  ;;  %1694 = vmatprep.subr.bf16.mxu1 %v1963_v7 }
 0x10f   : > { %910 = vst [vmem:[#allocation2 + $0x20] sm:$0xf] %v904_v24 }
 0x110   : > { %1660 = vmatmul.mubr.msk.f32.vlgmr.msra.gmra.mrb[2].mxu1 %vm396_vm5, %v670_v14 }
 0x111   : > { %v923_v25 = vpop.permute.xlu1 %922  ;;  %v921_v26 = vpop.permute.xlu0 %920  ;;  %1666 = vmatprep.mubr.msk.f32.mxu1 %vm1967_vm0, %v1966_v8 }
 0x112   : > { %v927_v27 = vsel %vm344_vm2, %v921_v26, %v923_v25  ;;  %v938_v36 = vld [vmem:[#allocation2 + $0x8] sm:$0xff] }
 0x113   : > { %933 = vst [vmem:[#allocation2 + $0x20] sm:$0xf0] %v927_v27 }
 0x115   : > { %v872_v28 = vpop.permute.xlu1 %871  ;;  %v848_v29 = vpop.permute.xlu0 %847 }
 0x116   : > { %v880_v30 = vsel %vm879_vm8, %v872_v28, %v874_v17  ;;  %v856_v31 = vsel %vm855_vm7, %v848_v29, %v850_v13  ;;  %v284_v29 = vlaneseq }
 0x117   : > { %886 = vst [vmem:[#allocation2] sm:$0xf0] %v880_v30  ;;  %862 = vst [vmem:[#allocation2] sm:$0xf] %v856_v31 }
 0x118   : > { %v285_v30 = vand.u32 127, %v284_v29 }
 0x119   : > { %v919_v32 = vpop.permute.xlu1 %918  ;;  %v896_v33 = vpop.permute.xlu0 %895 }
 0x11a   : > { %v926_v34 = vsel %vm344_vm2, %v919_v32, %v921_v26  ;;  %v903_v35 = vsel %vm320_vm1, %v896_v33, %v898_v23  ;;  %v941_v37 = vld [vmem:[#allocation2 + $0x20] sm:$0xff]  ;;  %v286_v31 = vadd.s32 128, %v285_v30  ;;  %v287_v32 = vadd.s32 256, %v285_v30 }
 0x11b   : > { %932 = vst [vmem:[#allocation2 + $0x18] sm:$0xf0] %v926_v34  ;;  %909 = vst [vmem:[#allocation2 + $0x18] sm:$0xf] %v903_v35  ;;  %v1690_v38 = vpack.c.bf16 %v941_v37, %v938_v36  ;;  %v288_v33 = vcvt.s32.f32 %v285_v30 }
 0x11c   : > { %v289_v34 = vcvt.s32.f32 %v286_v31  ;;  %v290_v35 = vcvt.s32.f32 %v287_v32  ;;  %vm546_vm12 = vcmp.lt.s32.totalorder %v287_v32, 288 }
 0x11d   : > { %v878_v39 = vpop.permute.xlu1 %877  ;;  %1691 = vmatprep.subr.bf16.mxu0 %v1690_v38  ;;  %v854_v40 = vpop.permute.xlu0 %853  ;;  %v291_v36 = vadd.f32 0.5, %v288_v33 }
 0x11e   : > { %v882_v41 = vsel %vm879_vm8, %v876_v16, %v878_v39  ;;  %v858_v42 = vsel %vm855_vm7, %v852_v12, %v854_v40  ;;  %v937_v47 = vld [vmem:[#allocation2] sm:$0xff]  ;;  %v292_v37 = vadd.f32 0.5, %v289_v34  ;;  %v293_v38 = vadd.f32 0.5, %v290_v35 }
 0x11f   : > { %888 = vst [vmem:[#allocation2 + $0x10] sm:$0xf0] %v882_v41  ;;  %864 = vst [vmem:[#allocation2 + $0x10] sm:$0xf] %v858_v42  ;;  %v294_v39 = vmul.f32 0.055555556, %v291_v36 }
 0x120   : > { %v295_v40 = vmul.f32 0.055555556, %v292_v37  ;;  %v296_v41 = vmul.f32 0.055555556, %v293_v38 }
 0x121   : > { %v925_v43 = vpop.permute.xlu1 %924  ;;  %v902_v44 = vpop.permute.xlu0 %901  ;;  %v1705_v42 = vtrunc.f32 %v294_v39 }
 0x122   : > { %v928_v45 = vsel %vm344_vm2, %v923_v25, %v925_v43  ;;  %v905_v46 = vsel %vm320_vm1, %v900_v22, %v902_v44  ;;  %v940_v48 = vld [vmem:[#allocation2 + $0x18] sm:$0xff]  ;;  %v1201_v25 = vld [vmem:[#allocation7 + $0x18] sm:$0xff]  ;;  %v1707_v43 = vtrunc.f32 %v295_v40  ;;  %v1709_v44 = vtrunc.f32 %v296_v41 }
 0x123   : > { %934 = vst [vmem:[#allocation2 + $0x28] sm:$0xf0] %v928_v45  ;;  %911 = vst [vmem:[#allocation2 + $0x28] sm:$0xf] %v905_v46  ;;  %v1692_v49 = vpack.c.bf16 %v940_v48, %v937_v47  ;;  %v1706_v45 = vcvt.f32.s32 %v1705_v42 }
 0x124   : > { %v1708_v46 = vcvt.f32.s32 %v1707_v43  ;;  %v1710_v47 = vcvt.f32.s32 %v1709_v44 }
 0x125   : > { %v1118_v50 = vpop.permute.xlu1 %1117  ;;  %1693 = vmatpush1.bf16.msra.mxu0 %v1692_v49  ;;  %v1116_v51 = vpop.permute.xlu0 %1115  ;;  %v300_v48 = vmul.u32 18, %v1706_v45 }
 0x126   : > { %v1123_v53 = vsel %vm1121_vm9, %v1116_v51, %v1118_v50  ;;  %v939_v57 = vld [vmem:[#allocation2 + $0x10] sm:$0xff]  ;;  %v301_v49 = vmul.u32 18, %v1708_v46 }
 0x127   : > { %1129 = vst [vmem:[#allocation2 + $0x8] sm:$0xf] %v1123_v53 }
 0x128   : > { %1619 = vmatmul.mubr.msk.f32.vlgmr.msra.gmra.mrb[4].mxu0 %vm396_vm5, %v936_v52 }
 0x129   : > { %v1142_v54 = vpop.permute.xlu1 %1141  ;;  %v1140_v55 = vpop.permute.xlu0 %1139  ;;  %1275 = vmatprep.mubr.f32.mxu0 %v1966_v8 }
 0x12a   : > { %v1146_v56 = vsel %vm855_vm7, %v1140_v55, %v1142_v54  ;;  %v942_v58 = vld [vmem:[#allocation2 + $0x28] sm:$0xff] }
 0x12b   : > { %1152 = vst [vmem:[#allocation2 + $0x8] sm:$0xf0] %v1146_v56  ;;  %v1695_v59 = vpack.c.bf16 %v942_v58, %v939_v57 }
 0x12d   : > { %v1165_v60 = vpop.permute.xlu1 %1164  ;;  %1696 = vmatpush3.bf16.msra.mxu1 %v1695_v59  ;;  %v1163_v61 = vpop.permute.xlu0 %1162 }
 0x12e   : > { %v1169_v62 = vsel %vm589_vm4, %v1163_v61, %v1165_v60  ;;  %1701 = vmatprep.subr.bf16.mxu1 %v1963_v7 }
 0x12f   : > { %1175 = vst [vmem:[#allocation2 + $0x20] sm:$0xf] %v1169_v62 }
 0x130   : > { %1667 = vmatmul.mubr.msk.f32.vlgmr.msra.gmra.mrb[4].mxu1 %vm396_vm5, %v936_v52  ;;  %v304_v52 = vsub.s32 %v286_v31, %v301_v49  ;;  %v1971_v49 = vmov 0  }
 0x131   : > { %v1188_v63 = vpop.permute.xlu1 %1187  ;;  %v1186_v0 = vpop.permute.xlu0 %1185  ;;  %1673 = vmatprep.mubr.msk.f32.mxu1 %vm1967_vm0, %v1966_v8  ;;  %1801 = vset.pattern.permute.xlu1 %v1971_v49 }
 0x132   : > { %v1192_v1 = vsel %vm320_vm1, %v1186_v0, %v1188_v63  ;;  %v1203_v11 = vld [vmem:[#allocation2 + $0x8] sm:$0xff]  ;;  %vm548_vm11 = vcmp.lt.s32.totalorder %v304_v52, 16  ;;  %1802 = vset.pattern.permute.xlu0 %v1971_v49 }
 0x133   : > { %1198 = vst [vmem:[#allocation2 + $0x20] sm:$0xf0] %v1192_v1 }
 0x135   : > { %v1138_v2 = vpop.permute.xlu1 %1137  ;;  %v1114_v3 = vpop.permute.xlu0 %1113 }
 0x136   : > { %v1145_v4 = vsel %vm855_vm7, %v1138_v2, %v1140_v55  ;;  %v1122_v5 = vsel %vm1121_vm9, %v1114_v3, %v1116_v51  ;;  %v303_v51 = vsub.s32 %v285_v30, %v300_v48  ;;  %v1615_v55 = vsel %vm548_vm11, 1.0, %v1966_v8 }
 0x137   : > { %1151 = vst [vmem:[#allocation2] sm:$0xf0] %v1145_v4  ;;  %1128 = vst [vmem:[#allocation2] sm:$0xf] %v1122_v5 }
 0x138   : > { %vm547_vm10 = vcmp.lt.s32.totalorder %v303_v51, 16 }
 0x139   : > { %v1184_v7 = vpop.permute.xlu1 %1183  ;;  %v1161_v6 = vpop.permute.xlu0 %1160 }
 0x13a   : > { %v1191_v9 = vsel %vm320_vm1, %v1184_v7, %v1186_v0  ;;  %v1168_v10 = vsel %vm589_vm4, %v1161_v6, %v1163_v61  ;;  %v1206_v12 = vld [vmem:[#allocation2 + $0x20] sm:$0xff] }
 0x13b   : > { %1197 = vst [vmem:[#allocation2 + $0x18] sm:$0xf0] %v1191_v9  ;;  %1174 = vst [vmem:[#allocation2 + $0x18] sm:$0xf] %v1168_v10  ;;  %v1697_v13 = vpack.c.bf16 %v1206_v12, %v1203_v11 }
 0x13d   : > { %v1144_v14 = vpop.permute.xlu1 %1143  ;;  %1698 = vmatprep.subr.bf16.mxu0 %v1697_v13  ;;  %v1120_v15 = vpop.permute.xlu0 %1119 }
 0x13e   : > { %v1147_v16 = vsel %vm855_vm7, %v1142_v54, %v1144_v14  ;;  %v1124_v17 = vsel %vm1121_vm9, %v1118_v50, %v1120_v15  ;;  %v1202_v22 = vld [vmem:[#allocation2] sm:$0xff]  ;;  %v302_v50 = vmul.u32 18, %v1710_v47  ;;  %v1614_v54 = vsel %vm547_vm10, 1.0, %v1966_v8 }
 0x13f   : > { %1153 = vst [vmem:[#allocation2 + $0x10] sm:$0xf0] %v1147_v16  ;;  %1130 = vst [vmem:[#allocation2 + $0x10] sm:$0xf] %v1124_v17 }
 0x140   : > { %v305_v53 = vsub.s32 %v287_v32, %v302_v50 }
 0x141   : > { %v1190_v18 = vpop.permute.xlu1 %1189  ;;  %v1167_v19 = vpop.permute.xlu0 %1166 }
 0x142   : > { %v1193_v20 = vsel %vm320_vm1, %v1188_v63, %v1190_v18  ;;  %v1170_v21 = vsel %vm589_vm4, %v1165_v60, %v1167_v19  ;;  %v1205_v23 = vld [vmem:[#allocation2 + $0x18] sm:$0xff]  ;;  %vm549_vm13 = vcmp.lt.s32.totalorder %v305_v53, 16 }
 0x143   : > { %1199 = vst [vmem:[#allocation2 + $0x28] sm:$0xf0] %v1193_v20  ;;  %1176 = vst [vmem:[#allocation2 + $0x28] sm:$0xf] %v1170_v21  ;;  %v1699_v24 = vpack.c.bf16 %v1205_v23, %v1202_v22 }
 0x144   : > { %vm552_vm14 = vmand %vm546_vm12, %vm549_vm13 }
 0x145   : > { %1700 = vmatpush1.bf16.msra.mxu0 %v1699_v24  ;;  %v1616_v60 = vsel %vm552_vm14, 1.0, %v1966_v8 }
 0x146   : > { %v1204_v26 = vld [vmem:[#allocation2 + $0x10] sm:$0xff] }
 0x148   : > { %1621 = vmatmul.mubr.msk.f32.vlgmr.msra.gmra.mrb[6].mxu0 %vm396_vm5, %v1201_v25 }
 0x14a   : > { %v1207_v27 = vld [vmem:[#allocation2 + $0x28] sm:$0xff] }
 0x14b   : > { %v1702_v28 = vpack.c.bf16 %v1207_v27, %v1204_v26 }
 0x14d   : > { %1703 = vmatpush3.bf16.msra.mxu1 %v1702_v28 }
 0x150   : > { %1674 = vmatmul.mubr.msk.f32.vlgmr.msra.gmra.mrb[6].mxu1 %vm396_vm5, %v1201_v25 }
 0x1bf   : > { %v2353_v56 = vpop.f32.mrb[0].mxu0 }
 0x1c0   : > { %v559_v57 = vmul.f32 %v1614_v54, %v2353_v56  ;;  %v2356_v58 = vpop.f32.mrb[1].mxu0 }
 0x1c1   : > { %v560_v59 = vmul.f32 %v1615_v55, %v2356_v58 }
 0x1c2   : > { %v567_v61 = vmul.f32 %v559_v57, %v559_v57 }
 0x1c3   : > { %v568_v62 = vmul.f32 %v560_v59, %v560_v59  ;;  %v2360_v63 = vpop.f32.mrb[0].mxu1  ;;  %v562_v0 = vadd.f32 %v560_v59, %v559_v57 }
 0x1c4   : > { %v561_v1 = vmul.f32 %v1616_v60, %v2360_v63  ;;  %v1654_v2 = vpop.f32.mrb[1].mxu1 }
 0x1c5   : > { %v570_v3 = vadd.f32 %v568_v62, %v567_v61 }
 0x1c6   : > { %v563_v4 = vadd.f32 %v562_v0, %v561_v1  ;;  %v569_v5 = vmul.f32 %v561_v1, %v561_v1 }
 0x1c8   : > { %564 = vadd.xlane.f32.xlu0 %v563_v4  ;;  %v571_v7 = vadd.f32 %v570_v3, %v569_v5 }
 0x1cc   : > { %572 = vadd.xlane.f32.xlu0 %v571_v7 }
 0x1db   : > { %v2363_v6 = vpop.f32.mrb[2].mxu0 }
 0x1dc   : > { %v825_v9 = vmul.f32 %v1614_v54, %v2363_v6  ;;  %v2366_v10 = vpop.f32.mrb[3].mxu0 }
 0x1dd   : > { %v826_v8 = vmul.f32 %v1615_v55, %v2366_v10 }
 0x1de   : > { %v833_v11 = vmul.f32 %v825_v9, %v825_v9 }
 0x1df   : > { %v834_v12 = vmul.f32 %v826_v8, %v826_v8  ;;  %v828_v13 = vadd.f32 %v826_v8, %v825_v9 }
 0x1e1   : > { %v836_v14 = vadd.f32 %v834_v12, %v833_v11  ;;  %v1377_v11 = vld [vmem:[%s2454_s2] sm:$0xff] }
 0x1e3   : > { %v2369_v15 = vpop.f32.mrb[2].mxu1 }
 0x1e4   : > { %v827_v16 = vmul.f32 %v1616_v60, %v2369_v15  ;;  %v1661_v17 = vpop.f32.mrb[3].mxu1 }
 0x1e6   : > { %v829_v18 = vadd.f32 %v828_v13, %v827_v16  ;;  %v835_v19 = vmul.f32 %v827_v16, %v827_v16 }
 0x1e8   : > { %830 = vadd.xlane.f32.xlu1 %v829_v18  ;;  %v837_v20 = vadd.f32 %v836_v14, %v835_v19  ;;  %v1381_v14 = vld [vmem:[%s2455_s3] sm:$0xff] }
 0x1ea   : > { %838 = vadd.xlane.f32.xlu0 %v837_v20 }
 0x1fb   : > { %v2372_v21 = vpop.f32.mrb[4].mxu0 }
 0x1fc   : > { %v1091_v22 = vmul.f32 %v1614_v54, %v2372_v21  ;;  %v2375_v23 = vpop.f32.mrb[5].mxu0 }
 0x1fd   : > { %v1092_v24 = vmul.f32 %v1615_v55, %v2375_v23 }
 0x1fe   : > { %v1099_v25 = vmul.f32 %v1091_v22, %v1091_v22 }
 0x1ff   : > { %v1100_v26 = vmul.f32 %v1092_v24, %v1092_v24  ;;  %v1094_v27 = vadd.f32 %v1092_v24, %v1091_v22 }
 0x201   : > { %v1102_v28 = vadd.f32 %v1100_v26, %v1099_v25 }
 0x203   : > { %v2378_v29 = vpop.f32.mrb[4].mxu1 }
 0x204   : > { %v1093_v30 = vmul.f32 %v1616_v60, %v2378_v29  ;;  %v1668_v31 = vpop.f32.mrb[5].mxu1 }
 0x206   : > { %v1095_v32 = vadd.f32 %v1094_v27, %v1093_v30  ;;  %v1101_v33 = vmul.f32 %v1093_v30, %v1093_v30 }
 0x208   : > { %1096 = vadd.xlane.f32.xlu1 %v1095_v32  ;;  %v1103_v34 = vadd.f32 %v1102_v28, %v1101_v33 }
 0x20a   : > { %1104 = vadd.xlane.f32.xlu0 %v1103_v34 }
 0x21b   : > { %v1277_v35 = vpop.f32.mrb[6].mxu0 }
 0x21c   : > { %v1356_v36 = vmul.f32 %v1614_v54, %v1277_v35  ;;  %v1279_v37 = vpop.f32.mrb[7].mxu0 }
 0x21d   : > { %v1357_v38 = vmul.f32 %v1615_v55, %v1279_v37 }
 0x21e   : > { %v1364_v39 = vmul.f32 %v1356_v36, %v1356_v36 }
 0x21f   : > { %v1359_v40 = vadd.f32 %v1357_v38, %v1356_v36  ;;  %v1365_v41 = vmul.f32 %v1357_v38, %v1357_v38 }
 0x221   : > { %v1367_v42 = vadd.f32 %v1365_v41, %v1364_v39 }
 0x223   : > { %v1348_v43 = vpop.f32.mrb[6].mxu1 }
 0x224   : > { %v1358_v44 = vmul.f32 %v1616_v60, %v1348_v43  ;;  %v1675_v45 = vpop.f32.mrb[7].mxu1 }
 0x226   : > { %v1360_v46 = vadd.f32 %v1359_v40, %v1358_v44  ;;  %v1366_v47 = vmul.f32 %v1358_v44, %v1358_v44 }
 0x228   : > { %1361 = vadd.xlane.f32.xlu1 %v1360_v46  ;;  %v1368_v48 = vadd.f32 %v1367_v42, %v1366_v47 }
 0x22a   : > { %1369 = vadd.xlane.f32.xlu0 %v1368_v48 }
 0x255   : > { %v565_v50 = vpop.xlane.xlu0 %564 }
 0x259   : > { %v573_v51 = vpop.xlane.xlu0 %572 }
 0x275   : > { %v831_v52 = vpop.xlane.xlu1 %830 }
 0x276   : > { %v832_v54 = vadd.f32 %v831_v52, %v565_v50 }
 0x277   : > { %v839_v53 = vpop.xlane.xlu0 %838 }
 0x278   : > { %v840_v57 = vadd.f32 %v839_v53, %v573_v51 }
 0x295   : > { %v1097_v55 = vpop.xlane.xlu1 %1096 }
 0x296   : > { %v1098_v61 = vadd.f32 %v1097_v55, %v832_v54 }
 0x297   : > { %v1105_v59 = vpop.xlane.xlu0 %1104 }
 0x298   : > { %v1106_v60 = vadd.f32 %v1105_v59, %v840_v57 }
 0x2b5   : > { %v1362_v62 = vpop.xlane.xlu1 %1361 }
 0x2b6   : > { %v1363_v0 = vadd.f32 %v1362_v62, %v1098_v61 }
 0x2b7   : > { %v1370_v1 = vpop.xlane.xlu0 %1369 }
 0x2b8   : > { %v1372_v2 = vmul.f32 0.0009765625, %v1363_v0  ;;  %v1371_v3 = vadd.f32 %v1370_v1, %v1106_v60 }
 0x2ba   : > { %v1374_v4 = vmul.f32 %v1372_v2, %v1372_v2  ;;  %v1373_v5 = vmul.f32 0.0009765625, %v1371_v3 }
 0x2bc   : > { %v1375_v7 = vsub.f32 %v1373_v5, %v1374_v4 }
 0x2be   : > { %v1376_v9 = vmax.f32 %v1375_v7, 0.0 }
 0x2c0   : > { %v1378_v8 = vadd.f32 1e-05, %v1376_v9 }
 0x2c2   : > { %1808 = vrsqrt.f32 %v1378_v8 }
 0x2cc   : > { %v1809_v12 = vpop.eup %1808 }
 0x2cd   : > { %v1380_v13 = vmul.f32 %v1809_v12, %v1377_v11 }
 0x2cf   : > { %1389 = vperm.xlu1 %1801, %v1380_v13   ;;  %v1382_v16 = vmul.f32 %v1380_v13, %v1372_v2 }
 0x2d1   : > { %v1383_v17 = vsub.f32 %v1381_v14, %v1382_v16 }
 0x2d3   : > { %1397 = vperm.xlu0 %1802, %v1383_v17  }
 0x34e   : > { %v1390_v18 = vpop.permute.xlu1 %1389 }
 0x34f   : > { %v1392_v19 = vmul.f32 %v1390_v18, %v2353_v56  ;;  %v1393_v20 = vmul.f32 %v1390_v18, %v2356_v58  ;;  %v1394_v22 = vmul.f32 %v1390_v18, %v2360_v63  ;;  %v1412_v24 = vmul.f32 %v1390_v18, %v2363_v6 }
 0x350   : > { %v1413_v25 = vmul.f32 %v1390_v18, %v2366_v10  ;;  %v1414_v26 = vmul.f32 %v1390_v18, %v2369_v15  ;;  %v1428_v27 = vmul.f32 %v1390_v18, %v2372_v21  ;;  %v1429_v28 = vmul.f32 %v1390_v18, %v2375_v23 }
 0x351   : > { %v1430_v30 = vmul.f32 %v1390_v18, %v2378_v29  ;;  %v1444_v31 = vmul.f32 %v1390_v18, %v1277_v35  ;;  %v1445_v32 = vmul.f32 %v1390_v18, %v1279_v37  ;;  %v1446_v56 = vmul.f32 %v1390_v18, %v1348_v43 }
 0x352   : > { %v1398_v33 = vpop.permute.xlu0 %1397 }
 0x353   : > { %v1400_v58 = vadd.f32 %v1398_v33, %v1392_v19  ;;  %v1401_v34 = vadd.f32 %v1398_v33, %v1393_v20  ;;  %v1402_v63 = vadd.f32 %v1398_v33, %v1394_v22  ;;  %v1415_v36 = vadd.f32 %v1412_v24, %v1398_v33 }
 0x354   : > { %v1416_v6 = vadd.f32 %v1413_v25, %v1398_v33  ;;  %v1417_v38 = vadd.f32 %v1414_v26, %v1398_v33  ;;  %v1431_v10 = vadd.f32 %v1428_v27, %v1398_v33  ;;  %v1432_v39 = vadd.f32 %v1429_v28, %v1398_v33 }
 0x355   : > { %v1403_v15 = vmax.f32 %v1400_v58, 0.0  ;;  %v1404_v40 = vmax.f32 %v1401_v34, 0.0  ;;  %v1405_v21 = vmax.f32 %v1402_v63, 0.0  ;;  %v1418_v41 = vmax.f32 %v1415_v36, 0.0 }
 0x356   : > { %v1419_v23 = vmax.f32 %v1416_v6, 0.0  ;;  %v1420_v29 = vmax.f32 %v1417_v38, 0.0  ;;  %v1433_v35 = vadd.f32 %v1430_v30, %v1398_v33  ;;  %v1434_v37 = vmax.f32 %v1431_v10, 0.0 }
 0x357   : > { %1406 = vst [vmem:[%s275_s7] sm:$0xff] %v1403_v15  ;;  %1407 = vst [vmem:[%s275_s7 + $0x8] sm:$0xff] %v1404_v40  ;;  %v1435_v42 = vmax.f32 %v1432_v39, 0.0  ;;  %v1447_v43 = vadd.f32 %v1444_v31, %v1398_v33  ;;  %v1448_v44 = vadd.f32 %v1445_v32, %v1398_v33  ;;  %v1449_v45 = vadd.f32 %v1446_v56, %v1398_v33 }
 0x358   : > { %1408 = vst [vmem:[%s275_s7 + $0x10] sm:$0xff] %v1405_v21  ;;  %1623 = vst [vmem:[%s275_s7 + $0x18] sm:$0xff] %v1418_v41  ;;  %v1436_v46 = vmax.f32 %v1433_v35, 0.0 }
 0x359   : > { %1624 = vst [vmem:[%s275_s7 + $0x20] sm:$0xff] %v1419_v23  ;;  %1625 = vst [vmem:[%s275_s7 + $0x28] sm:$0xff] %v1420_v29  ;;  %v1450_v47 = vmax.f32 %v1447_v43, 0.0  ;;  %v1451_v48 = vmax.f32 %v1448_v44, 0.0  ;;  %v1452_v49 = vmax.f32 %v1449_v45, 0.0 }
 0x35a   : > { %1626 = vst [vmem:[%s275_s7 + $0x30] sm:$0xff] %v1434_v37  ;;  %1627 = vst [vmem:[%s275_s7 + $0x38] sm:$0xff] %v1435_v42 }
 0x35b   : > { %1628 = vst [vmem:[%s275_s7 + $0x40] sm:$0xff] %v1436_v46  ;;  %1629 = vst [vmem:[%s275_s7 + $0x48] sm:$0xff] %v1450_v47 }
 0x35c   : > { %1630 = vst [vmem:[%s275_s7 + $0x50] sm:$0xff] %v1451_v48  ;;  %1631 = vst [vmem:[%s275_s7 + $0x58] sm:$0xff] %v1452_v49 }
 0x35d   : > { %1881 = shalt.err (!%p1878_p5)
}
 0x35e   : > { %s1882_s29 = scalar_lea.hbm %s2401_s23, 1536  ;;  %s1886_s30 = scalar_lea.hbm %s2456_s4, 3072 }
 0x35f   : > { %p1883_p9 = scmp.ne.s32.totalorder %s2401_s23, %s1882_s29  ;;  %p1887_p7 = scmp.lt.u32.totalorder %s2401_s23, %s2456_s4 }
 0x360   : > { %p1888_p3 = scmp.lt.u32.totalorder %s1886_s30, %s1882_s29  ;;  %p1890_p13 = scmp.lt.u32.totalorder %s1882_s29, %s2401_s23 }
 0x361   : > { %p1884_p1 = pnand %p1883_p9, %p2096_p10 }
 0x362   : > { %p1889_p4 = por %p1888_p3, %p1887_p7 }
 0x363   : > { %p1885_p2 = pneg %p1884_p1 }
 0x364   : > { %p1891_p6 = por %p1890_p13, %p1889_p4 }
 0x366   : > { %p1892_p8 = pnand %p1891_p6, %p1885_p2 }
 0x368   : > { %1895 = shalt.err (!%p1892_p8)
}
 0x369   : > { %s1973_s7 = smov 384   ;;  %s1974_s18 = smov 24  }
 0x36a   : > { %1718 = dma.vmem_to_hbm [thread:$0]  (%p2096_p10), %s2403_s27, 1536, %s2401_s23, %s1458_s14, %s1973_s7, %s1973_s7, %s1974_s18  }
 0x36b PF: > { %s1488_s25 = sand.u32 1, %s1934_s15   ;;  %p2474_p12 = scmp.ne.s32.totalorder %s2464_s26, 0 }
 0x36c   : > { %p2475_p11 = scmp.ge.s32.totalorder %s1954_s20, 2  ;;  %s1489_s21 = scalar_lea.sflag [#allocation6], %s1488_s25 }
 0x36e   : > { %p1729_p0 = pnand %p2475_p11, %p2474_p12 }
 0x370   : > { %1929 = dma.done.wait (!%p1729_p0), %s1489_s21, 1536  }
 0x371   : > { %1931 = vsyncadd (!%p1729_p0), %s1489_s21, 4294965760  ;;  %s21_s20 = sadd.s32 1, %s1954_s20   ;;  %s2476_s15 = smov %s1938_s16 }
 0x372   : > { %p18_p5 = scmp.ge.s32.totalorder %s21_s20, 4   ;;  %s2477_s16 = smov %s1942_s17 }
 0x373   : > { %s2478_s17 = smov %s2105_s10  ;;  %s2479_s18 = smov %s1950_s19 }
 0x374   : > { %s2480_s19 = smov %s2482_s5  ;;  %20 = sbr.rel (!%p18_p5) target bundleno = 7 (0x7), region = 101 }
 0x37b   :  { %1494 = vsyncpa [#allocation5], 1 }
 0x37c   :  { %1496 = vsyncpa [#allocation5 + $0x1], 1 }
 0x37d   :  { %1497 = vsyncpa [#allocation8], 1 }
 0x37e   :  { %1498 = vsyncpa [#allocation6], 1 }
 0x37f   :  { %1500 = vsyncpa [#allocation6 + $0x1], 1 }

</bundles_post_ra>
